<compile_context>
chip_gen: v7x
topology: tpu7x:2x2x1
jax: 0.10.0
libtpu: 0.0.40
codegen_flags: <defaults>
</compile_context>

<pallas_src>
import functools
import math

import jax
import jax.numpy as jnp
from jax.experimental import pallas as pl
from jax.experimental.pallas import tpu as pltpu

SQRT_HALF = math.sqrt(0.5)
NORM_EPS = 1e-12                 # F.normalize default eps
NORM_EPS_SQ = NORM_EPS * NORM_EPS


def _tree_sum(parts):
    """Pairwise (log-depth) sum of a list of equally shaped arrays."""
    parts = list(parts)
    while len(parts) > 1:
        nxt = [parts[i] + parts[i + 1] for i in range(0, len(parts) - 1, 2)]
        if len(parts) % 2 == 1:
            nxt.append(parts[-1])
        parts = nxt
    return parts[0]


# ---------------------------------------------------------------------------
# Fused encoder kernel factory.
#
# Inputs:
#   tok   [B, L] int32 (SMEM)      token ids
#   emb   [vocab, 1, H] f32 (VMEM) embedding table
#   per LSTM layer l:
#     wih   [Din_l, 8H] bf16       concat(W_ih_fwd, W_ih_bwd) along gate axis
#     whh_f [H, 4H]     bf16       recurrent weights, forward direction
#     whh_b [H, 4H]     bf16       recurrent weights, backward direction
#     bias  [1, 8H]     f32        concat(b_fwd, b_bwd), each = b_ih + b_hh
#   wp [2H, H] bf16, bp [1, H] f32          out_proj
#   per MLP layer i: wm_i bf16, bm_i f32
#   wr [H, 1] bf16, br [1, 1] f32           regressor
# Outputs:
#   enc2d [B, L*H] f32   (batch-major; wrapper reshape -> [B, L, H], free)
#   h_n   [2*layers, B, H], c_n [2*layers, B, H]   (PyTorch ordering)
#   arch  [B, H],  pred [B, 1]
# ---------------------------------------------------------------------------
def make_encoder_kernel(layers, n_mlp, L, B, H):
    G4 = 4 * H

    def kernel(*refs):
        idx = 0
        tok_ref = refs[idx]; idx += 1
        emb_ref = refs[idx]; idx += 1
        lstm_refs = []
        for _ in range(layers):
            lstm_refs.append(tuple(refs[idx:idx + 4]))
            idx += 4
        wp_ref, bp_ref = refs[idx], refs[idx + 1]; idx += 2
        mlp_refs = []
        for _ in range(n_mlp):
            mlp_refs.append((refs[idx], refs[idx + 1]))
            idx += 2
        wr_ref, br_ref = refs[idx], refs[idx + 1]; idx += 2
        enc_ref, hn_ref, cn_ref, arch_ref, pred_ref = refs[idx:idx + 5]

        # ---- fused embedding gather (SMEM scalar ids -> dynamic row loads) ----
        rows = []
        for t in range(L):
            for b in range(B):
                tok = tok_ref[b, t]                 # scalar int32 from SMEM
                rows.append(emb_ref[tok])           # [1, H] dynamic first-axis load
        x_tm = jnp.concatenate(rows, axis=0)        # [L*B, H] f32, time-major

        def lstm_cell(gates, c):
            i_g = jax.nn.sigmoid(gates[:, 0:H])
            f_g = jax.nn.sigmoid(gates[:, H:2 * H])
            g_g = jnp.tanh(gates[:, 2 * H:3 * H])
            o_g = jax.nn.sigmoid(gates[:, 3 * H:4 * H])
            c_new = f_g * c + i_g * g_g
            h_new = o_g * jnp.tanh(c_new)
            return h_new, c_new

        inp_tm = x_tm
        for l in range(layers):
            wih_ref, whhf_ref, whhb_ref, b_ref = lstm_refs[l]

            # Hoisted input projection for BOTH directions (bf16 MXU, f32 acc),
            # pre-summed biases folded in once.
            gx = jnp.dot(inp_tm.astype(jnp.bfloat16), wih_ref[...],
                         preferred_element_type=jnp.float32) + b_ref[...]   # [L*B, 8H]

            # Time-aligned per-step gate inputs, kept as values (vregs).
            gxf = [gx[t * B:(t + 1) * B, 0:G4] for t in range(L)]
            gxb = [gx[(L - 1 - t) * B:(L - t) * B, G4:2 * G4] for t in range(L)]

            whh_f = whhf_ref[...]          # [H, 4H] bf16
            whh_b = whhb_ref[...]          # [H, 4H] bf16

            # Two independent recurrence chains (fwd / bwd); the fully unrolled
            # loop is one basic block so the scheduler interleaves them.
            h_f = jnp.zeros((B, H), jnp.float32)
            c_f = jnp.zeros((B, H), jnp.float32)
            h_b = jnp.zeros((B, H), jnp.float32)
            c_b = jnp.zeros((B, H), jnp.float32)
            outs_f = [None] * L
            outs_b = [None] * L
            for t in range(L):
                gh_f = jnp.dot(h_f.astype(jnp.bfloat16), whh_f,
                               preferred_element_type=jnp.float32)          # [B, 4H]
                h_f, c_f = lstm_cell(gxf[t] + gh_f, c_f)
                outs_f[t] = h_f

                gh_b = jnp.dot(h_b.astype(jnp.bfloat16), whh_b,
                               preferred_element_type=jnp.float32)          # [B, 4H]
                h_b, c_b = lstm_cell(gxb[t] + gh_b, c_b)
                outs_b[L - 1 - t] = h_b

            hn_ref[2 * l] = h_f
            hn_ref[2 * l + 1] = h_b
            cn_ref[2 * l] = c_f
            cn_ref[2 * l + 1] = c_b

            # Assemble this layer's bidirectional output in vregs (no scratch).
            inp_tm = jnp.concatenate(
                [jnp.concatenate([outs_f[t], outs_b[t]], axis=1) for t in range(L)],
                axis=0)                                                      # [L*B, 2H]

        # ---- out_proj -> residual*sqrt(0.5) -> L2 normalize (rsqrt) ----
        proj = jnp.dot(inp_tm.astype(jnp.bfloat16), wp_ref[...],
                       preferred_element_type=jnp.float32) + bp_ref[...]     # [L*B, H]
        out = (proj + x_tm) * SQRT_HALF
        ssq = jnp.sum(out * out, axis=-1, keepdims=True)
        enc = out * jax.lax.rsqrt(jnp.maximum(ssq, NORM_EPS_SQ))

        # Batch-major write: position t goes to lane slab [t*H:(t+1)*H].
        parts = [enc[t * B:(t + 1) * B, :] for t in range(L)]                # each [B, H]
        for t in range(L):
            enc_ref[:, t * H:(t + 1) * H] = parts[t]

        # ---- sequence mean (log-depth tree) -> normalize ----
        m = _tree_sum(parts) * (1.0 / L)
        msq = jnp.sum(m * m, axis=-1, keepdims=True)
        arch = m * jax.lax.rsqrt(jnp.maximum(msq, NORM_EPS_SQ))
        arch_ref[...] = arch

        # ---- MLP(ReLU) -> residual*sqrt(0.5) -> regressor -> sigmoid ----
        hmlp = arch
        for i in range(n_mlp):
            wm_ref, bm_ref = mlp_refs[i]
            hmlp = jnp.maximum(
                jnp.dot(hmlp.astype(jnp.bfloat16), wm_ref[...],
                        preferred_element_type=jnp.float32) + bm_ref[...], 0.0)
        res = (arch + hmlp) * SQRT_HALF
        logit = jnp.dot(res.astype(jnp.bfloat16), wr_ref[...],
                        preferred_element_type=jnp.float32) + br_ref[...]
        pred_ref[...] = jax.nn.sigmoid(logit)

    return kernel


# ---------------------------------------------------------------------------
# Parameter init: synthetic, deterministic, and ALREADY packed / pre-cast
# (concat + bf16 cast happens once here, never per forward call).
# ---------------------------------------------------------------------------
def init_params(key, layers, vocab, H, M, mlp_layers):
    k = key

    def nxt():
        nonlocal k
        k, sub = jax.random.split(k)
        return sub

    params = {}
    emb = jax.random.normal(nxt(), (vocab, H), jnp.float32) * 0.1
    params['embedding'] = emb.reshape(vocab, 1, H)          # leading-axis gather layout

    lstm = []
    for l in range(layers):
        din = H if l == 0 else 2 * H
        wih_d, whh_d, b_d = [], [], []
        for _d in range(2):                                  # fwd, bwd
            wih_d.append(jax.random.normal(nxt(), (din, 4 * H), jnp.float32) / math.sqrt(H))
            whh_d.append(jax.random.normal(nxt(), (H, 4 * H), jnp.float32) / math.sqrt(H))
            # single bias per direction == (b_ih + b_hh) of nn.LSTM
            b_d.append(jax.random.normal(nxt(), (1, 4 * H), jnp.float32) * 0.01)
        lstm.append({
            'wih': jnp.concatenate(wih_d, axis=1).astype(jnp.bfloat16),   # [din, 8H]
            'whh_f': whh_d[0].astype(jnp.bfloat16),                       # [H, 4H]
            'whh_b': whh_d[1].astype(jnp.bfloat16),                       # [H, 4H]
            'bias': jnp.concatenate(b_d, axis=1),                         # [1, 8H] f32
        })
    params['lstm'] = lstm

    params['wp'] = (jax.random.normal(nxt(), (2 * H, H), jnp.float32)
                    / math.sqrt(2 * H)).astype(jnp.bfloat16)
    params['bp'] = jnp.zeros((1, H), jnp.float32)

    mlp = []
    for i in range(mlp_layers):
        if i == 0:
            din, dout = H, M
        elif i == mlp_layers - 1:
            din, dout = M, H
        else:
            din, dout = M, M
        w = (jax.random.normal(nxt(), (din, dout), jnp.float32)
             / math.sqrt(din)).astype(jnp.bfloat16)
        mlp.append((w, jnp.zeros((1, dout), jnp.float32)))
    params['mlp'] = mlp

    params['wr'] = (jax.random.normal(nxt(), (H, 1), jnp.float32)
                    / math.sqrt(H)).astype(jnp.bfloat16)
    params['br'] = jnp.zeros((1, 1), jnp.float32)
    return params


# ---------------------------------------------------------------------------
# Forward wrapper: ONE pallas_call, zero wrapper-side compute.
# ---------------------------------------------------------------------------
def encoder_forward(params, x_tokens, *, layers, H, length, source_length):
    B, S = x_tokens.shape
    assert S == source_length == length          # ratio == 1 path of the module
    L = length
    n_mlp = len(params['mlp'])

    inputs = [x_tokens, params['embedding']]
    for lp in params['lstm']:
        inputs += [lp['wih'], lp['whh_f'], lp['whh_b'], lp['bias']]
    inputs += [params['wp'], params['bp']]
    for w, b in params['mlp']:
        inputs += [w, b]
    inputs += [params['wr'], params['br']]

    smem = pl.BlockSpec(memory_space=pltpu.MemorySpace.SMEM)
    vmem = pl.BlockSpec(memory_space=pltpu.MemorySpace.VMEM)

    enc2d, h_n, c_n, arch_emb, pred = pl.pallas_call(
        make_encoder_kernel(layers, n_mlp, L, B, H),
        out_shape=(jax.ShapeDtypeStruct((B, L * H), jnp.float32),
                   jax.ShapeDtypeStruct((2 * layers, B, H), jnp.float32),
                   jax.ShapeDtypeStruct((2 * layers, B, H), jnp.float32),
                   jax.ShapeDtypeStruct((B, H), jnp.float32),
                   jax.ShapeDtypeStruct((B, 1), jnp.float32)),
        in_specs=[smem] + [vmem] * (len(inputs) - 1),
        out_specs=(vmem, vmem, vmem, vmem, vmem),
    )(*inputs)

    encoder_outputs = enc2d.reshape(B, L, H)     # metadata-only reshape (no transpose)
    encoder_hidden = (h_n, c_n)
    return encoder_outputs, encoder_hidden, arch_emb, pred


if __name__ == "__main__":
    # module hyperparameters (small, consistent with the PyTorch __init__)
    layers = 1
    mlp_layers = 2
    vocab_size = 12
    hidden_size = 32
    mlp_hidden_size = 32
    dropout = 0.1          # eval mode -> no-op
    length = 8
    source_length = 8      # == length, so no ratio reshape branch
    B = 2

    key = jax.random.PRNGKey(0)
    kp, kx = jax.random.split(key)
    params = init_params(kp, layers, vocab_size, hidden_size,
                         mlp_hidden_size, mlp_layers)
    x = jax.random.randint(kx, (B, source_length), 0, vocab_size,
                           dtype=jnp.int32)

    fwd = jax.jit(functools.partial(encoder_forward, layers=layers,
                                    H=hidden_size, length=length,
                                    source_length=source_length))
    enc_out, (h_n, c_n), arch_emb, pred = fwd(params, x)

    jax.block_until_ready((enc_out, h_n, c_n, arch_emb, pred))
    assert enc_out.shape == (B, length, hidden_size)
    assert h_n.shape == (2 * layers, B, hidden_size)
    assert c_n.shape == (2 * layers, B, hidden_size)
    assert arch_emb.shape == (B, hidden_size)
    assert pred.shape == (B, 1)
    assert bool(jnp.all(jnp.isfinite(pred)))
    print("KERNEL_OK")
</pallas_src>

<mosaic_0001>
module attributes {stable_mosaic.version = 11 : i64} {
  func.func @kernel(%arg0: memref<2x8xi32, #tpu.memory_space<smem>>, %arg1: memref<12x1x32xf32, #tpu.memory_space<vmem>>, %arg2: memref<32x256xbf16, #tpu.memory_space<vmem>>, %arg3: memref<32x128xbf16, #tpu.memory_space<vmem>>, %arg4: memref<32x128xbf16, #tpu.memory_space<vmem>>, %arg5: memref<1x256xf32, #tpu.memory_space<vmem>>, %arg6: memref<64x32xbf16, #tpu.memory_space<vmem>>, %arg7: memref<1x32xf32, #tpu.memory_space<vmem>>, %arg8: memref<32x32xbf16, #tpu.memory_space<vmem>>, %arg9: memref<1x32xf32, #tpu.memory_space<vmem>>, %arg10: memref<32x32xbf16, #tpu.memory_space<vmem>>, %arg11: memref<1x32xf32, #tpu.memory_space<vmem>>, %arg12: memref<32x1xbf16, #tpu.memory_space<vmem>>, %arg13: memref<1x1xf32, #tpu.memory_space<vmem>>, %arg14: memref<2x256xf32, #tpu.memory_space<vmem>>, %arg15: memref<2x2x32xf32, #tpu.memory_space<vmem>>, %arg16: memref<2x2x32xf32, #tpu.memory_space<vmem>>, %arg17: memref<2x32xf32, #tpu.memory_space<vmem>>, %arg18: memref<2x1xf32, #tpu.memory_space<vmem>>) attributes {dimension_semantics = [], scalar_prefetch = 0 : i64, scratch_operands = 0 : i64, tpu.core_type = #tpu.core_type<tc>} {
    %c0 = arith.constant 0 : index
    %c0_0 = arith.constant 0 : index
    %0 = memref.load %arg0[%c0, %c0_0] : memref<2x8xi32, #tpu.memory_space<smem>>
    %1 = arith.index_cast %0 : i32 to index
    %c0_1 = arith.constant 0 : index
    %c0_2 = arith.constant 0 : index
    %2 = vector.load %arg1[%1, %c0_1, %c0_2] : memref<12x1x32xf32, #tpu.memory_space<vmem>>, vector<1x1x32xf32>
    %3 = vector.shape_cast %2 : vector<1x1x32xf32> to vector<1x32xf32>
    %c1 = arith.constant 1 : index
    %c0_3 = arith.constant 0 : index
    %4 = memref.load %arg0[%c1, %c0_3] : memref<2x8xi32, #tpu.memory_space<smem>>
    %5 = arith.index_cast %4 : i32 to index
    %c0_4 = arith.constant 0 : index
    %c0_5 = arith.constant 0 : index
    %6 = vector.load %arg1[%5, %c0_4, %c0_5] : memref<12x1x32xf32, #tpu.memory_space<vmem>>, vector<1x1x32xf32>
    %7 = vector.shape_cast %6 : vector<1x1x32xf32> to vector<1x32xf32>
    %c0_6 = arith.constant 0 : index
    %c1_7 = arith.constant 1 : index
    %8 = memref.load %arg0[%c0_6, %c1_7] : memref<2x8xi32, #tpu.memory_space<smem>>
    %9 = arith.index_cast %8 : i32 to index
    %c0_8 = arith.constant 0 : index
    %c0_9 = arith.constant 0 : index
    %10 = vector.load %arg1[%9, %c0_8, %c0_9] : memref<12x1x32xf32, #tpu.memory_space<vmem>>, vector<1x1x32xf32>
    %11 = vector.shape_cast %10 : vector<1x1x32xf32> to vector<1x32xf32>
    %c1_10 = arith.constant 1 : index
    %c1_11 = arith.constant 1 : index
    %12 = memref.load %arg0[%c1_10, %c1_11] : memref<2x8xi32, #tpu.memory_space<smem>>
    %13 = arith.index_cast %12 : i32 to index
    %c0_12 = arith.constant 0 : index
    %c0_13 = arith.constant 0 : index
    %14 = vector.load %arg1[%13, %c0_12, %c0_13] : memref<12x1x32xf32, #tpu.memory_space<vmem>>, vector<1x1x32xf32>
    %15 = vector.shape_cast %14 : vector<1x1x32xf32> to vector<1x32xf32>
    %c0_14 = arith.constant 0 : index
    %c2 = arith.constant 2 : index
    %16 = memref.load %arg0[%c0_14, %c2] : memref<2x8xi32, #tpu.memory_space<smem>>
    %17 = arith.index_cast %16 : i32 to index
    %c0_15 = arith.constant 0 : index
    %c0_16 = arith.constant 0 : index
    %18 = vector.load %arg1[%17, %c0_15, %c0_16] : memref<12x1x32xf32, #tpu.memory_space<vmem>>, vector<1x1x32xf32>
    %19 = vector.shape_cast %18 : vector<1x1x32xf32> to vector<1x32xf32>
    %c1_17 = arith.constant 1 : index
    %c2_18 = arith.constant 2 : index
    %20 = memref.load %arg0[%c1_17, %c2_18] : memref<2x8xi32, #tpu.memory_space<smem>>
    %21 = arith.index_cast %20 : i32 to index
    %c0_19 = arith.constant 0 : index
    %c0_20 = arith.constant 0 : index
    %22 = vector.load %arg1[%21, %c0_19, %c0_20] : memref<12x1x32xf32, #tpu.memory_space<vmem>>, vector<1x1x32xf32>
    %23 = vector.shape_cast %22 : vector<1x1x32xf32> to vector<1x32xf32>
    %c0_21 = arith.constant 0 : index
    %c3 = arith.constant 3 : index
    %24 = memref.load %arg0[%c0_21, %c3] : memref<2x8xi32, #tpu.memory_space<smem>>
    %25 = arith.index_cast %24 : i32 to index
    %c0_22 = arith.constant 0 : index
    %c0_23 = arith.constant 0 : index
    %26 = vector.load %arg1[%25, %c0_22, %c0_23] : memref<12x1x32xf32, #tpu.memory_space<vmem>>, vector<1x1x32xf32>
    %27 = vector.shape_cast %26 : vector<1x1x32xf32> to vector<1x32xf32>
    %c1_24 = arith.constant 1 : index
    %c3_25 = arith.constant 3 : index
    %28 = memref.load %arg0[%c1_24, %c3_25] : memref<2x8xi32, #tpu.memory_space<smem>>
    %29 = arith.index_cast %28 : i32 to index
    %c0_26 = arith.constant 0 : index
    %c0_27 = arith.constant 0 : index
    %30 = vector.load %arg1[%29, %c0_26, %c0_27] : memref<12x1x32xf32, #tpu.memory_space<vmem>>, vector<1x1x32xf32>
    %31 = vector.shape_cast %30 : vector<1x1x32xf32> to vector<1x32xf32>
    %c0_28 = arith.constant 0 : index
    %c4 = arith.constant 4 : index
    %32 = memref.load %arg0[%c0_28, %c4] : memref<2x8xi32, #tpu.memory_space<smem>>
    %33 = arith.index_cast %32 : i32 to index
    %c0_29 = arith.constant 0 : index
    %c0_30 = arith.constant 0 : index
    %34 = vector.load %arg1[%33, %c0_29, %c0_30] : memref<12x1x32xf32, #tpu.memory_space<vmem>>, vector<1x1x32xf32>
    %35 = vector.shape_cast %34 : vector<1x1x32xf32> to vector<1x32xf32>
    %c1_31 = arith.constant 1 : index
    %c4_32 = arith.constant 4 : index
    %36 = memref.load %arg0[%c1_31, %c4_32] : memref<2x8xi32, #tpu.memory_space<smem>>
    %37 = arith.index_cast %36 : i32 to index
    %c0_33 = arith.constant 0 : index
    %c0_34 = arith.constant 0 : index
    %38 = vector.load %arg1[%37, %c0_33, %c0_34] : memref<12x1x32xf32, #tpu.memory_space<vmem>>, vector<1x1x32xf32>
    %39 = vector.shape_cast %38 : vector<1x1x32xf32> to vector<1x32xf32>
    %c0_35 = arith.constant 0 : index
    %c5 = arith.constant 5 : index
    %40 = memref.load %arg0[%c0_35, %c5] : memref<2x8xi32, #tpu.memory_space<smem>>
    %41 = arith.index_cast %40 : i32 to index
    %c0_36 = arith.constant 0 : index
    %c0_37 = arith.constant 0 : index
    %42 = vector.load %arg1[%41, %c0_36, %c0_37] : memref<12x1x32xf32, #tpu.memory_space<vmem>>, vector<1x1x32xf32>
    %43 = vector.shape_cast %42 : vector<1x1x32xf32> to vector<1x32xf32>
    %c1_38 = arith.constant 1 : index
    %c5_39 = arith.constant 5 : index
    %44 = memref.load %arg0[%c1_38, %c5_39] : memref<2x8xi32, #tpu.memory_space<smem>>
    %45 = arith.index_cast %44 : i32 to index
    %c0_40 = arith.constant 0 : index
    %c0_41 = arith.constant 0 : index
    %46 = vector.load %arg1[%45, %c0_40, %c0_41] : memref<12x1x32xf32, #tpu.memory_space<vmem>>, vector<1x1x32xf32>
    %47 = vector.shape_cast %46 : vector<1x1x32xf32> to vector<1x32xf32>
    %c0_42 = arith.constant 0 : index
    %c6 = arith.constant 6 : index
    %48 = memref.load %arg0[%c0_42, %c6] : memref<2x8xi32, #tpu.memory_space<smem>>
    %49 = arith.index_cast %48 : i32 to index
    %c0_43 = arith.constant 0 : index
    %c0_44 = arith.constant 0 : index
    %50 = vector.load %arg1[%49, %c0_43, %c0_44] : memref<12x1x32xf32, #tpu.memory_space<vmem>>, vector<1x1x32xf32>
    %51 = vector.shape_cast %50 : vector<1x1x32xf32> to vector<1x32xf32>
    %c1_45 = arith.constant 1 : index
    %c6_46 = arith.constant 6 : index
    %52 = memref.load %arg0[%c1_45, %c6_46] : memref<2x8xi32, #tpu.memory_space<smem>>
    %53 = arith.index_cast %52 : i32 to index
    %c0_47 = arith.constant 0 : index
    %c0_48 = arith.constant 0 : index
    %54 = vector.load %arg1[%53, %c0_47, %c0_48] : memref<12x1x32xf32, #tpu.memory_space<vmem>>, vector<1x1x32xf32>
    %55 = vector.shape_cast %54 : vector<1x1x32xf32> to vector<1x32xf32>
    %c0_49 = arith.constant 0 : index
    %c7 = arith.constant 7 : index
    %56 = memref.load %arg0[%c0_49, %c7] : memref<2x8xi32, #tpu.memory_space<smem>>
    %57 = arith.index_cast %56 : i32 to index
    %c0_50 = arith.constant 0 : index
    %c0_51 = arith.constant 0 : index
    %58 = vector.load %arg1[%57, %c0_50, %c0_51] : memref<12x1x32xf32, #tpu.memory_space<vmem>>, vector<1x1x32xf32>
    %59 = vector.shape_cast %58 : vector<1x1x32xf32> to vector<1x32xf32>
    %c1_52 = arith.constant 1 : index
    %c7_53 = arith.constant 7 : index
    %60 = memref.load %arg0[%c1_52, %c7_53] : memref<2x8xi32, #tpu.memory_space<smem>>
    %61 = arith.index_cast %60 : i32 to index
    %c0_54 = arith.constant 0 : index
    %c0_55 = arith.constant 0 : index
    %62 = vector.load %arg1[%61, %c0_54, %c0_55] : memref<12x1x32xf32, #tpu.memory_space<vmem>>, vector<1x1x32xf32>
    %63 = vector.shape_cast %62 : vector<1x1x32xf32> to vector<1x32xf32>
    %64 = tpu.concatenate %3, %7, %11, %15, %19, %23, %27, %31, %35, %39, %43, %47, %51, %55, %59, %63 in 0 : vector<1x32xf32>, vector<1x32xf32>, vector<1x32xf32>, vector<1x32xf32>, vector<1x32xf32>, vector<1x32xf32>, vector<1x32xf32>, vector<1x32xf32>, vector<1x32xf32>, vector<1x32xf32>, vector<1x32xf32>, vector<1x32xf32>, vector<1x32xf32>, vector<1x32xf32>, vector<1x32xf32>, vector<1x32xf32> -> vector<16x32xf32>
    %65 = arith.truncf %64 : vector<16x32xf32> to vector<16x32xbf16>
    %c0_56 = arith.constant 0 : index
    %c0_57 = arith.constant 0 : index
    %66 = vector.load %arg2[%c0_56, %c0_57] : memref<32x256xbf16, #tpu.memory_space<vmem>>, vector<32x256xbf16>
    %cst = arith.constant dense<0.000000e+00> : vector<16x256xf32>
    %67 = tpu.matmul %65, %66, %cst {dimension_numbers = #tpu.dot_dimension_numbers<[1], [0], [0], [1], [0, 0, 1, 1], [], []>} : vector<16x32xbf16>, vector<32x256xbf16>, vector<16x256xf32> -> vector<16x256xf32>
    %c0_58 = arith.constant 0 : index
    %c0_59 = arith.constant 0 : index
    %68 = vector.load %arg5[%c0_58, %c0_59] : memref<1x256xf32, #tpu.memory_space<vmem>>, vector<1x256xf32>
    %69 = vector.broadcast %68 : vector<1x256xf32> to vector<16x256xf32>
    %70 = arith.addf %67, %69 : vector<16x256xf32>
    %71 = vector.extract_strided_slice %70 {offsets = [0, 0], sizes = [2, 128], strides = [1, 1]} : vector<16x256xf32> to vector<2x128xf32>
    %72 = vector.extract_strided_slice %70 {offsets = [2, 0], sizes = [2, 128], strides = [1, 1]} : vector<16x256xf32> to vector<2x128xf32>
    %73 = vector.extract_strided_slice %70 {offsets = [4, 0], sizes = [2, 128], strides = [1, 1]} : vector<16x256xf32> to vector<2x128xf32>
    %74 = vector.extract_strided_slice %70 {offsets = [6, 0], sizes = [2, 128], strides = [1, 1]} : vector<16x256xf32> to vector<2x128xf32>
    %75 = vector.extract_strided_slice %70 {offsets = [8, 0], sizes = [2, 128], strides = [1, 1]} : vector<16x256xf32> to vector<2x128xf32>
    %76 = vector.extract_strided_slice %70 {offsets = [10, 0], sizes = [2, 128], strides = [1, 1]} : vector<16x256xf32> to vector<2x128xf32>
    %77 = vector.extract_strided_slice %70 {offsets = [12, 0], sizes = [2, 128], strides = [1, 1]} : vector<16x256xf32> to vector<2x128xf32>
    %78 = vector.extract_strided_slice %70 {offsets = [14, 0], sizes = [2, 128], strides = [1, 1]} : vector<16x256xf32> to vector<2x128xf32>
    %79 = vector.extract_strided_slice %70 {offsets = [14, 128], sizes = [2, 128], strides = [1, 1]} : vector<16x256xf32> to vector<2x128xf32>
    %80 = vector.extract_strided_slice %70 {offsets = [12, 128], sizes = [2, 128], strides = [1, 1]} : vector<16x256xf32> to vector<2x128xf32>
    %81 = vector.extract_strided_slice %70 {offsets = [10, 128], sizes = [2, 128], strides = [1, 1]} : vector<16x256xf32> to vector<2x128xf32>
    %82 = vector.extract_strided_slice %70 {offsets = [8, 128], sizes = [2, 128], strides = [1, 1]} : vector<16x256xf32> to vector<2x128xf32>
    %83 = vector.extract_strided_slice %70 {offsets = [6, 128], sizes = [2, 128], strides = [1, 1]} : vector<16x256xf32> to vector<2x128xf32>
    %84 = vector.extract_strided_slice %70 {offsets = [4, 128], sizes = [2, 128], strides = [1, 1]} : vector<16x256xf32> to vector<2x128xf32>
    %85 = vector.extract_strided_slice %70 {offsets = [2, 128], sizes = [2, 128], strides = [1, 1]} : vector<16x256xf32> to vector<2x128xf32>
    %86 = vector.extract_strided_slice %70 {offsets = [0, 128], sizes = [2, 128], strides = [1, 1]} : vector<16x256xf32> to vector<2x128xf32>
    %c0_60 = arith.constant 0 : index
    %c0_61 = arith.constant 0 : index
    %87 = vector.load %arg3[%c0_60, %c0_61] : memref<32x128xbf16, #tpu.memory_space<vmem>>, vector<32x128xbf16>
    %c0_62 = arith.constant 0 : index
    %c0_63 = arith.constant 0 : index
    %88 = vector.load %arg4[%c0_62, %c0_63] : memref<32x128xbf16, #tpu.memory_space<vmem>>, vector<32x128xbf16>
    %cst_64 = arith.constant 0.000000e+00 : f32
    %89 = vector.broadcast %cst_64 : f32 to vector<2x32xf32>
    %cst_65 = arith.constant 0.000000e+00 : f32
    %90 = vector.broadcast %cst_65 : f32 to vector<2x32xf32>
    %cst_66 = arith.constant 0.000000e+00 : f32
    %91 = vector.broadcast %cst_66 : f32 to vector<2x32xf32>
    %cst_67 = arith.constant 0.000000e+00 : f32
    %92 = vector.broadcast %cst_67 : f32 to vector<2x32xf32>
    %93 = arith.truncf %89 : vector<2x32xf32> to vector<2x32xbf16>
    %cst_68 = arith.constant dense<0.000000e+00> : vector<2x128xf32>
    %94 = tpu.matmul %93, %87, %cst_68 {dimension_numbers = #tpu.dot_dimension_numbers<[1], [0], [0], [1], [0, 0, 1, 1], [], []>} : vector<2x32xbf16>, vector<32x128xbf16>, vector<2x128xf32> -> vector<2x128xf32>
    %95 = arith.addf %71, %94 : vector<2x128xf32>
    %96 = vector.extract_strided_slice %95 {offsets = [0, 0], sizes = [2, 32], strides = [1, 1]} : vector<2x128xf32> to vector<2x32xf32>
    %97 = arith.negf %96 : vector<2x32xf32>
    %98 = math.exp %97 : vector<2x32xf32>
    %cst_69 = arith.constant 1.000000e+00 : f32
    %99 = vector.broadcast %cst_69 : f32 to vector<2x32xf32>
    %100 = arith.addf %99, %98 : vector<2x32xf32>
    %101 = arith.divf %99, %100 : vector<2x32xf32>
    %102 = vector.extract_strided_slice %95 {offsets = [0, 32], sizes = [2, 32], strides = [1, 1]} : vector<2x128xf32> to vector<2x32xf32>
    %103 = arith.negf %102 : vector<2x32xf32>
    %104 = math.exp %103 : vector<2x32xf32>
    %cst_70 = arith.constant 1.000000e+00 : f32
    %105 = vector.broadcast %cst_70 : f32 to vector<2x32xf32>
    %106 = arith.addf %105, %104 : vector<2x32xf32>
    %107 = arith.divf %105, %106 : vector<2x32xf32>
    %108 = vector.extract_strided_slice %95 {offsets = [0, 64], sizes = [2, 32], strides = [1, 1]} : vector<2x128xf32> to vector<2x32xf32>
    %109 = math.tanh %108 : vector<2x32xf32>
    %110 = vector.extract_strided_slice %95 {offsets = [0, 96], sizes = [2, 32], strides = [1, 1]} : vector<2x128xf32> to vector<2x32xf32>
    %111 = arith.negf %110 : vector<2x32xf32>
    %112 = math.exp %111 : vector<2x32xf32>
    %cst_71 = arith.constant 1.000000e+00 : f32
    %113 = vector.broadcast %cst_71 : f32 to vector<2x32xf32>
    %114 = arith.addf %113, %112 : vector<2x32xf32>
    %115 = arith.divf %113, %114 : vector<2x32xf32>
    %116 = arith.mulf %107, %90 : vector<2x32xf32>
    %117 = arith.mulf %101, %109 : vector<2x32xf32>
    %118 = arith.addf %116, %117 : vector<2x32xf32>
    %119 = math.tanh %118 : vector<2x32xf32>
    %120 = arith.mulf %115, %119 : vector<2x32xf32>
    %121 = arith.truncf %91 : vector<2x32xf32> to vector<2x32xbf16>
    %cst_72 = arith.constant dense<0.000000e+00> : vector<2x128xf32>
    %122 = tpu.matmul %121, %88, %cst_72 {dimension_numbers = #tpu.dot_dimension_numbers<[1], [0], [0], [1], [0, 0, 1, 1], [], []>} : vector<2x32xbf16>, vector<32x128xbf16>, vector<2x128xf32> -> vector<2x128xf32>
    %123 = arith.addf %79, %122 : vector<2x128xf32>
    %124 = vector.extract_strided_slice %123 {offsets = [0, 0], sizes = [2, 32], strides = [1, 1]} : vector<2x128xf32> to vector<2x32xf32>
    %125 = arith.negf %124 : vector<2x32xf32>
    %126 = math.exp %125 : vector<2x32xf32>
    %cst_73 = arith.constant 1.000000e+00 : f32
    %127 = vector.broadcast %cst_73 : f32 to vector<2x32xf32>
    %128 = arith.addf %127, %126 : vector<2x32xf32>
    %129 = arith.divf %127, %128 : vector<2x32xf32>
    %130 = vector.extract_strided_slice %123 {offsets = [0, 32], sizes = [2, 32], strides = [1, 1]} : vector<2x128xf32> to vector<2x32xf32>
    %131 = arith.negf %130 : vector<2x32xf32>
    %132 = math.exp %131 : vector<2x32xf32>
    %cst_74 = arith.constant 1.000000e+00 : f32
    %133 = vector.broadcast %cst_74 : f32 to vector<2x32xf32>
    %134 = arith.addf %133, %132 : vector<2x32xf32>
    %135 = arith.divf %133, %134 : vector<2x32xf32>
    %136 = vector.extract_strided_slice %123 {offsets = [0, 64], sizes = [2, 32], strides = [1, 1]} : vector<2x128xf32> to vector<2x32xf32>
    %137 = math.tanh %136 : vector<2x32xf32>
    %138 = vector.extract_strided_slice %123 {offsets = [0, 96], sizes = [2, 32], strides = [1, 1]} : vector<2x128xf32> to vector<2x32xf32>
    %139 = arith.negf %138 : vector<2x32xf32>
    %140 = math.exp %139 : vector<2x32xf32>
    %cst_75 = arith.constant 1.000000e+00 : f32
    %141 = vector.broadcast %cst_75 : f32 to vector<2x32xf32>
    %142 = arith.addf %141, %140 : vector<2x32xf32>
    %143 = arith.divf %141, %142 : vector<2x32xf32>
    %144 = arith.mulf %135, %92 : vector<2x32xf32>
    %145 = arith.mulf %129, %137 : vector<2x32xf32>
    %146 = arith.addf %144, %145 : vector<2x32xf32>
    %147 = math.tanh %146 : vector<2x32xf32>
    %148 = arith.mulf %143, %147 : vector<2x32xf32>
    %149 = arith.truncf %120 : vector<2x32xf32> to vector<2x32xbf16>
    %cst_76 = arith.constant dense<0.000000e+00> : vector<2x128xf32>
    %150 = tpu.matmul %149, %87, %cst_76 {dimension_numbers = #tpu.dot_dimension_numbers<[1], [0], [0], [1], [0, 0, 1, 1], [], []>} : vector<2x32xbf16>, vector<32x128xbf16>, vector<2x128xf32> -> vector<2x128xf32>
    %151 = arith.addf %72, %150 : vector<2x128xf32>
    %152 = vector.extract_strided_slice %151 {offsets = [0, 0], sizes = [2, 32], strides = [1, 1]} : vector<2x128xf32> to vector<2x32xf32>
    %153 = arith.negf %152 : vector<2x32xf32>
    %154 = math.exp %153 : vector<2x32xf32>
    %cst_77 = arith.constant 1.000000e+00 : f32
    %155 = vector.broadcast %cst_77 : f32 to vector<2x32xf32>
    %156 = arith.addf %155, %154 : vector<2x32xf32>
    %157 = arith.divf %155, %156 : vector<2x32xf32>
    %158 = vector.extract_strided_slice %151 {offsets = [0, 32], sizes = [2, 32], strides = [1, 1]} : vector<2x128xf32> to vector<2x32xf32>
    %159 = arith.negf %158 : vector<2x32xf32>
    %160 = math.exp %159 : vector<2x32xf32>
    %cst_78 = arith.constant 1.000000e+00 : f32
    %161 = vector.broadcast %cst_78 : f32 to vector<2x32xf32>
    %162 = arith.addf %161, %160 : vector<2x32xf32>
    %163 = arith.divf %161, %162 : vector<2x32xf32>
    %164 = vector.extract_strided_slice %151 {offsets = [0, 64], sizes = [2, 32], strides = [1, 1]} : vector<2x128xf32> to vector<2x32xf32>
    %165 = math.tanh %164 : vector<2x32xf32>
    %166 = vector.extract_strided_slice %151 {offsets = [0, 96], sizes = [2, 32], strides = [1, 1]} : vector<2x128xf32> to vector<2x32xf32>
    %167 = arith.negf %166 : vector<2x32xf32>
    %168 = math.exp %167 : vector<2x32xf32>
    %cst_79 = arith.constant 1.000000e+00 : f32
    %169 = vector.broadcast %cst_79 : f32 to vector<2x32xf32>
    %170 = arith.addf %169, %168 : vector<2x32xf32>
    %171 = arith.divf %169, %170 : vector<2x32xf32>
    %172 = arith.mulf %163, %118 : vector<2x32xf32>
    %173 = arith.mulf %157, %165 : vector<2x32xf32>
    %174 = arith.addf %172, %173 : vector<2x32xf32>
    %175 = math.tanh %174 : vector<2x32xf32>
    %176 = arith.mulf %171, %175 : vector<2x32xf32>
    %177 = arith.truncf %148 : vector<2x32xf32> to vector<2x32xbf16>
    %cst_80 = arith.constant dense<0.000000e+00> : vector<2x128xf32>
    %178 = tpu.matmul %177, %88, %cst_80 {dimension_numbers = #tpu.dot_dimension_numbers<[1], [0], [0], [1], [0, 0, 1, 1], [], []>} : vector<2x32xbf16>, vector<32x128xbf16>, vector<2x128xf32> -> vector<2x128xf32>
    %179 = arith.addf %80, %178 : vector<2x128xf32>
    %180 = vector.extract_strided_slice %179 {offsets = [0, 0], sizes = [2, 32], strides = [1, 1]} : vector<2x128xf32> to vector<2x32xf32>
    %181 = arith.negf %180 : vector<2x32xf32>
    %182 = math.exp %181 : vector<2x32xf32>
    %cst_81 = arith.constant 1.000000e+00 : f32
    %183 = vector.broadcast %cst_81 : f32 to vector<2x32xf32>
    %184 = arith.addf %183, %182 : vector<2x32xf32>
    %185 = arith.divf %183, %184 : vector<2x32xf32>
    %186 = vector.extract_strided_slice %179 {offsets = [0, 32], sizes = [2, 32], strides = [1, 1]} : vector<2x128xf32> to vector<2x32xf32>
    %187 = arith.negf %186 : vector<2x32xf32>
    %188 = math.exp %187 : vector<2x32xf32>
    %cst_82 = arith.constant 1.000000e+00 : f32
    %189 = vector.broadcast %cst_82 : f32 to vector<2x32xf32>
    %190 = arith.addf %189, %188 : vector<2x32xf32>
    %191 = arith.divf %189, %190 : vector<2x32xf32>
    %192 = vector.extract_strided_slice %179 {offsets = [0, 64], sizes = [2, 32], strides = [1, 1]} : vector<2x128xf32> to vector<2x32xf32>
    %193 = math.tanh %192 : vector<2x32xf32>
    %194 = vector.extract_strided_slice %179 {offsets = [0, 96], sizes = [2, 32], strides = [1, 1]} : vector<2x128xf32> to vector<2x32xf32>
    %195 = arith.negf %194 : vector<2x32xf32>
    %196 = math.exp %195 : vector<2x32xf32>
    %cst_83 = arith.constant 1.000000e+00 : f32
    %197 = vector.broadcast %cst_83 : f32 to vector<2x32xf32>
    %198 = arith.addf %197, %196 : vector<2x32xf32>
    %199 = arith.divf %197, %198 : vector<2x32xf32>
    %200 = arith.mulf %191, %146 : vector<2x32xf32>
    %201 = arith.mulf %185, %193 : vector<2x32xf32>
    %202 = arith.addf %200, %201 : vector<2x32xf32>
    %203 = math.tanh %202 : vector<2x32xf32>
    %204 = arith.mulf %199, %203 : vector<2x32xf32>
    %205 = arith.truncf %176 : vector<2x32xf32> to vector<2x32xbf16>
    %cst_84 = arith.constant dense<0.000000e+00> : vector<2x128xf32>
    %206 = tpu.matmul %205, %87, %cst_84 {dimension_numbers = #tpu.dot_dimension_numbers<[1], [0], [0], [1], [0, 0, 1, 1], [], []>} : vector<2x32xbf16>, vector<32x128xbf16>, vector<2x128xf32> -> vector<2x128xf32>
    %207 = arith.addf %73, %206 : vector<2x128xf32>
    %208 = vector.extract_strided_slice %207 {offsets = [0, 0], sizes = [2, 32], strides = [1, 1]} : vector<2x128xf32> to vector<2x32xf32>
    %209 = arith.negf %208 : vector<2x32xf32>
    %210 = math.exp %209 : vector<2x32xf32>
    %cst_85 = arith.constant 1.000000e+00 : f32
    %211 = vector.broadcast %cst_85 : f32 to vector<2x32xf32>
    %212 = arith.addf %211, %210 : vector<2x32xf32>
    %213 = arith.divf %211, %212 : vector<2x32xf32>
    %214 = vector.extract_strided_slice %207 {offsets = [0, 32], sizes = [2, 32], strides = [1, 1]} : vector<2x128xf32> to vector<2x32xf32>
    %215 = arith.negf %214 : vector<2x32xf32>
    %216 = math.exp %215 : vector<2x32xf32>
    %cst_86 = arith.constant 1.000000e+00 : f32
    %217 = vector.broadcast %cst_86 : f32 to vector<2x32xf32>
    %218 = arith.addf %217, %216 : vector<2x32xf32>
    %219 = arith.divf %217, %218 : vector<2x32xf32>
    %220 = vector.extract_strided_slice %207 {offsets = [0, 64], sizes = [2, 32], strides = [1, 1]} : vector<2x128xf32> to vector<2x32xf32>
    %221 = math.tanh %220 : vector<2x32xf32>
    %222 = vector.extract_strided_slice %207 {offsets = [0, 96], sizes = [2, 32], strides = [1, 1]} : vector<2x128xf32> to vector<2x32xf32>
    %223 = arith.negf %222 : vector<2x32xf32>
    %224 = math.exp %223 : vector<2x32xf32>
    %cst_87 = arith.constant 1.000000e+00 : f32
    %225 = vector.broadcast %cst_87 : f32 to vector<2x32xf32>
    %226 = arith.addf %225, %224 : vector<2x32xf32>
    %227 = arith.divf %225, %226 : vector<2x32xf32>
    %228 = arith.mulf %219, %174 : vector<2x32xf32>
    %229 = arith.mulf %213, %221 : vector<2x32xf32>
    %230 = arith.addf %228, %229 : vector<2x32xf32>
    %231 = math.tanh %230 : vector<2x32xf32>
    %232 = arith.mulf %227, %231 : vector<2x32xf32>
    %233 = arith.truncf %204 : vector<2x32xf32> to vector<2x32xbf16>
    %cst_88 = arith.constant dense<0.000000e+00> : vector<2x128xf32>
    %234 = tpu.matmul %233, %88, %cst_88 {dimension_numbers = #tpu.dot_dimension_numbers<[1], [0], [0], [1], [0, 0, 1, 1], [], []>} : vector<2x32xbf16>, vector<32x128xbf16>, vector<2x128xf32> -> vector<2x128xf32>
    %235 = arith.addf %81, %234 : vector<2x128xf32>
    %236 = vector.extract_strided_slice %235 {offsets = [0, 0], sizes = [2, 32], strides = [1, 1]} : vector<2x128xf32> to vector<2x32xf32>
    %237 = arith.negf %236 : vector<2x32xf32>
    %238 = math.exp %237 : vector<2x32xf32>
    %cst_89 = arith.constant 1.000000e+00 : f32
    %239 = vector.broadcast %cst_89 : f32 to vector<2x32xf32>
    %240 = arith.addf %239, %238 : vector<2x32xf32>
    %241 = arith.divf %239, %240 : vector<2x32xf32>
    %242 = vector.extract_strided_slice %235 {offsets = [0, 32], sizes = [2, 32], strides = [1, 1]} : vector<2x128xf32> to vector<2x32xf32>
    %243 = arith.negf %242 : vector<2x32xf32>
    %244 = math.exp %243 : vector<2x32xf32>
    %cst_90 = arith.constant 1.000000e+00 : f32
    %245 = vector.broadcast %cst_90 : f32 to vector<2x32xf32>
    %246 = arith.addf %245, %244 : vector<2x32xf32>
    %247 = arith.divf %245, %246 : vector<2x32xf32>
    %248 = vector.extract_strided_slice %235 {offsets = [0, 64], sizes = [2, 32], strides = [1, 1]} : vector<2x128xf32> to vector<2x32xf32>
    %249 = math.tanh %248 : vector<2x32xf32>
    %250 = vector.extract_strided_slice %235 {offsets = [0, 96], sizes = [2, 32], strides = [1, 1]} : vector<2x128xf32> to vector<2x32xf32>
    %251 = arith.negf %250 : vector<2x32xf32>
    %252 = math.exp %251 : vector<2x32xf32>
    %cst_91 = arith.constant 1.000000e+00 : f32
    %253 = vector.broadcast %cst_91 : f32 to vector<2x32xf32>
    %254 = arith.addf %253, %252 : vector<2x32xf32>
    %255 = arith.divf %253, %254 : vector<2x32xf32>
    %256 = arith.mulf %247, %202 : vector<2x32xf32>
    %257 = arith.mulf %241, %249 : vector<2x32xf32>
    %258 = arith.addf %256, %257 : vector<2x32xf32>
    %259 = math.tanh %258 : vector<2x32xf32>
    %260 = arith.mulf %255, %259 : vector<2x32xf32>
    %261 = arith.truncf %232 : vector<2x32xf32> to vector<2x32xbf16>
    %cst_92 = arith.constant dense<0.000000e+00> : vector<2x128xf32>
    %262 = tpu.matmul %261, %87, %cst_92 {dimension_numbers = #tpu.dot_dimension_numbers<[1], [0], [0], [1], [0, 0, 1, 1], [], []>} : vector<2x32xbf16>, vector<32x128xbf16>, vector<2x128xf32> -> vector<2x128xf32>
    %263 = arith.addf %74, %262 : vector<2x128xf32>
    %264 = vector.extract_strided_slice %263 {offsets = [0, 0], sizes = [2, 32], strides = [1, 1]} : vector<2x128xf32> to vector<2x32xf32>
    %265 = arith.negf %264 : vector<2x32xf32>
    %266 = math.exp %265 : vector<2x32xf32>
    %cst_93 = arith.constant 1.000000e+00 : f32
    %267 = vector.broadcast %cst_93 : f32 to vector<2x32xf32>
    %268 = arith.addf %267, %266 : vector<2x32xf32>
    %269 = arith.divf %267, %268 : vector<2x32xf32>
    %270 = vector.extract_strided_slice %263 {offsets = [0, 32], sizes = [2, 32], strides = [1, 1]} : vector<2x128xf32> to vector<2x32xf32>
    %271 = arith.negf %270 : vector<2x32xf32>
    %272 = math.exp %271 : vector<2x32xf32>
    %cst_94 = arith.constant 1.000000e+00 : f32
    %273 = vector.broadcast %cst_94 : f32 to vector<2x32xf32>
    %274 = arith.addf %273, %272 : vector<2x32xf32>
    %275 = arith.divf %273, %274 : vector<2x32xf32>
    %276 = vector.extract_strided_slice %263 {offsets = [0, 64], sizes = [2, 32], strides = [1, 1]} : vector<2x128xf32> to vector<2x32xf32>
    %277 = math.tanh %276 : vector<2x32xf32>
    %278 = vector.extract_strided_slice %263 {offsets = [0, 96], sizes = [2, 32], strides = [1, 1]} : vector<2x128xf32> to vector<2x32xf32>
    %279 = arith.negf %278 : vector<2x32xf32>
    %280 = math.exp %279 : vector<2x32xf32>
    %cst_95 = arith.constant 1.000000e+00 : f32
    %281 = vector.broadcast %cst_95 : f32 to vector<2x32xf32>
    %282 = arith.addf %281, %280 : vector<2x32xf32>
    %283 = arith.divf %281, %282 : vector<2x32xf32>
    %284 = arith.mulf %275, %230 : vector<2x32xf32>
    %285 = arith.mulf %269, %277 : vector<2x32xf32>
    %286 = arith.addf %284, %285 : vector<2x32xf32>
    %287 = math.tanh %286 : vector<2x32xf32>
    %288 = arith.mulf %283, %287 : vector<2x32xf32>
    %289 = arith.truncf %260 : vector<2x32xf32> to vector<2x32xbf16>
    %cst_96 = arith.constant dense<0.000000e+00> : vector<2x128xf32>
    %290 = tpu.matmul %289, %88, %cst_96 {dimension_numbers = #tpu.dot_dimension_numbers<[1], [0], [0], [1], [0, 0, 1, 1], [], []>} : vector<2x32xbf16>, vector<32x128xbf16>, vector<2x128xf32> -> vector<2x128xf32>
    %291 = arith.addf %82, %290 : vector<2x128xf32>
    %292 = vector.extract_strided_slice %291 {offsets = [0, 0], sizes = [2, 32], strides = [1, 1]} : vector<2x128xf32> to vector<2x32xf32>
    %293 = arith.negf %292 : vector<2x32xf32>
    %294 = math.exp %293 : vector<2x32xf32>
    %cst_97 = arith.constant 1.000000e+00 : f32
    %295 = vector.broadcast %cst_97 : f32 to vector<2x32xf32>
    %296 = arith.addf %295, %294 : vector<2x32xf32>
    %297 = arith.divf %295, %296 : vector<2x32xf32>
    %298 = vector.extract_strided_slice %291 {offsets = [0, 32], sizes = [2, 32], strides = [1, 1]} : vector<2x128xf32> to vector<2x32xf32>
    %299 = arith.negf %298 : vector<2x32xf32>
    %300 = math.exp %299 : vector<2x32xf32>
    %cst_98 = arith.constant 1.000000e+00 : f32
    %301 = vector.broadcast %cst_98 : f32 to vector<2x32xf32>
    %302 = arith.addf %301, %300 : vector<2x32xf32>
    %303 = arith.divf %301, %302 : vector<2x32xf32>
    %304 = vector.extract_strided_slice %291 {offsets = [0, 64], sizes = [2, 32], strides = [1, 1]} : vector<2x128xf32> to vector<2x32xf32>
    %305 = math.tanh %304 : vector<2x32xf32>
    %306 = vector.extract_strided_slice %291 {offsets = [0, 96], sizes = [2, 32], strides = [1, 1]} : vector<2x128xf32> to vector<2x32xf32>
    %307 = arith.negf %306 : vector<2x32xf32>
    %308 = math.exp %307 : vector<2x32xf32>
    %cst_99 = arith.constant 1.000000e+00 : f32
    %309 = vector.broadcast %cst_99 : f32 to vector<2x32xf32>
    %310 = arith.addf %309, %308 : vector<2x32xf32>
    %311 = arith.divf %309, %310 : vector<2x32xf32>
    %312 = arith.mulf %303, %258 : vector<2x32xf32>
    %313 = arith.mulf %297, %305 : vector<2x32xf32>
    %314 = arith.addf %312, %313 : vector<2x32xf32>
    %315 = math.tanh %314 : vector<2x32xf32>
    %316 = arith.mulf %311, %315 : vector<2x32xf32>
    %317 = arith.truncf %288 : vector<2x32xf32> to vector<2x32xbf16>
    %cst_100 = arith.constant dense<0.000000e+00> : vector<2x128xf32>
    %318 = tpu.matmul %317, %87, %cst_100 {dimension_numbers = #tpu.dot_dimension_numbers<[1], [0], [0], [1], [0, 0, 1, 1], [], []>} : vector<2x32xbf16>, vector<32x128xbf16>, vector<2x128xf32> -> vector<2x128xf32>
    %319 = arith.addf %75, %318 : vector<2x128xf32>
    %320 = vector.extract_strided_slice %319 {offsets = [0, 0], sizes = [2, 32], strides = [1, 1]} : vector<2x128xf32> to vector<2x32xf32>
    %321 = arith.negf %320 : vector<2x32xf32>
    %322 = math.exp %321 : vector<2x32xf32>
    %cst_101 = arith.constant 1.000000e+00 : f32
    %323 = vector.broadcast %cst_101 : f32 to vector<2x32xf32>
    %324 = arith.addf %323, %322 : vector<2x32xf32>
    %325 = arith.divf %323, %324 : vector<2x32xf32>
    %326 = vector.extract_strided_slice %319 {offsets = [0, 32], sizes = [2, 32], strides = [1, 1]} : vector<2x128xf32> to vector<2x32xf32>
    %327 = arith.negf %326 : vector<2x32xf32>
    %328 = math.exp %327 : vector<2x32xf32>
    %cst_102 = arith.constant 1.000000e+00 : f32
    %329 = vector.broadcast %cst_102 : f32 to vector<2x32xf32>
    %330 = arith.addf %329, %328 : vector<2x32xf32>
    %331 = arith.divf %329, %330 : vector<2x32xf32>
    %332 = vector.extract_strided_slice %319 {offsets = [0, 64], sizes = [2, 32], strides = [1, 1]} : vector<2x128xf32> to vector<2x32xf32>
    %333 = math.tanh %332 : vector<2x32xf32>
    %334 = vector.extract_strided_slice %319 {offsets = [0, 96], sizes = [2, 32], strides = [1, 1]} : vector<2x128xf32> to vector<2x32xf32>
    %335 = arith.negf %334 : vector<2x32xf32>
    %336 = math.exp %335 : vector<2x32xf32>
    %cst_103 = arith.constant 1.000000e+00 : f32
    %337 = vector.broadcast %cst_103 : f32 to vector<2x32xf32>
    %338 = arith.addf %337, %336 : vector<2x32xf32>
    %339 = arith.divf %337, %338 : vector<2x32xf32>
    %340 = arith.mulf %331, %286 : vector<2x32xf32>
    %341 = arith.mulf %325, %333 : vector<2x32xf32>
    %342 = arith.addf %340, %341 : vector<2x32xf32>
    %343 = math.tanh %342 : vector<2x32xf32>
    %344 = arith.mulf %339, %343 : vector<2x32xf32>
    %345 = arith.truncf %316 : vector<2x32xf32> to vector<2x32xbf16>
    %cst_104 = arith.constant dense<0.000000e+00> : vector<2x128xf32>
    %346 = tpu.matmul %345, %88, %cst_104 {dimension_numbers = #tpu.dot_dimension_numbers<[1], [0], [0], [1], [0, 0, 1, 1], [], []>} : vector<2x32xbf16>, vector<32x128xbf16>, vector<2x128xf32> -> vector<2x128xf32>
    %347 = arith.addf %83, %346 : vector<2x128xf32>
    %348 = vector.extract_strided_slice %347 {offsets = [0, 0], sizes = [2, 32], strides = [1, 1]} : vector<2x128xf32> to vector<2x32xf32>
    %349 = arith.negf %348 : vector<2x32xf32>
    %350 = math.exp %349 : vector<2x32xf32>
    %cst_105 = arith.constant 1.000000e+00 : f32
    %351 = vector.broadcast %cst_105 : f32 to vector<2x32xf32>
    %352 = arith.addf %351, %350 : vector<2x32xf32>
    %353 = arith.divf %351, %352 : vector<2x32xf32>
    %354 = vector.extract_strided_slice %347 {offsets = [0, 32], sizes = [2, 32], strides = [1, 1]} : vector<2x128xf32> to vector<2x32xf32>
    %355 = arith.negf %354 : vector<2x32xf32>
    %356 = math.exp %355 : vector<2x32xf32>
    %cst_106 = arith.constant 1.000000e+00 : f32
    %357 = vector.broadcast %cst_106 : f32 to vector<2x32xf32>
    %358 = arith.addf %357, %356 : vector<2x32xf32>
    %359 = arith.divf %357, %358 : vector<2x32xf32>
    %360 = vector.extract_strided_slice %347 {offsets = [0, 64], sizes = [2, 32], strides = [1, 1]} : vector<2x128xf32> to vector<2x32xf32>
    %361 = math.tanh %360 : vector<2x32xf32>
    %362 = vector.extract_strided_slice %347 {offsets = [0, 96], sizes = [2, 32], strides = [1, 1]} : vector<2x128xf32> to vector<2x32xf32>
    %363 = arith.negf %362 : vector<2x32xf32>
    %364 = math.exp %363 : vector<2x32xf32>
    %cst_107 = arith.constant 1.000000e+00 : f32
    %365 = vector.broadcast %cst_107 : f32 to vector<2x32xf32>
    %366 = arith.addf %365, %364 : vector<2x32xf32>
    %367 = arith.divf %365, %366 : vector<2x32xf32>
    %368 = arith.mulf %359, %314 : vector<2x32xf32>
    %369 = arith.mulf %353, %361 : vector<2x32xf32>
    %370 = arith.addf %368, %369 : vector<2x32xf32>
    %371 = math.tanh %370 : vector<2x32xf32>
    %372 = arith.mulf %367, %371 : vector<2x32xf32>
    %373 = arith.truncf %344 : vector<2x32xf32> to vector<2x32xbf16>
    %cst_108 = arith.constant dense<0.000000e+00> : vector<2x128xf32>
    %374 = tpu.matmul %373, %87, %cst_108 {dimension_numbers = #tpu.dot_dimension_numbers<[1], [0], [0], [1], [0, 0, 1, 1], [], []>} : vector<2x32xbf16>, vector<32x128xbf16>, vector<2x128xf32> -> vector<2x128xf32>
    %375 = arith.addf %76, %374 : vector<2x128xf32>
    %376 = vector.extract_strided_slice %375 {offsets = [0, 0], sizes = [2, 32], strides = [1, 1]} : vector<2x128xf32> to vector<2x32xf32>
    %377 = arith.negf %376 : vector<2x32xf32>
    %378 = math.exp %377 : vector<2x32xf32>
    %cst_109 = arith.constant 1.000000e+00 : f32
    %379 = vector.broadcast %cst_109 : f32 to vector<2x32xf32>
    %380 = arith.addf %379, %378 : vector<2x32xf32>
    %381 = arith.divf %379, %380 : vector<2x32xf32>
    %382 = vector.extract_strided_slice %375 {offsets = [0, 32], sizes = [2, 32], strides = [1, 1]} : vector<2x128xf32> to vector<2x32xf32>
    %383 = arith.negf %382 : vector<2x32xf32>
    %384 = math.exp %383 : vector<2x32xf32>
    %cst_110 = arith.constant 1.000000e+00 : f32
    %385 = vector.broadcast %cst_110 : f32 to vector<2x32xf32>
    %386 = arith.addf %385, %384 : vector<2x32xf32>
    %387 = arith.divf %385, %386 : vector<2x32xf32>
    %388 = vector.extract_strided_slice %375 {offsets = [0, 64], sizes = [2, 32], strides = [1, 1]} : vector<2x128xf32> to vector<2x32xf32>
    %389 = math.tanh %388 : vector<2x32xf32>
    %390 = vector.extract_strided_slice %375 {offsets = [0, 96], sizes = [2, 32], strides = [1, 1]} : vector<2x128xf32> to vector<2x32xf32>
    %391 = arith.negf %390 : vector<2x32xf32>
    %392 = math.exp %391 : vector<2x32xf32>
    %cst_111 = arith.constant 1.000000e+00 : f32
    %393 = vector.broadcast %cst_111 : f32 to vector<2x32xf32>
    %394 = arith.addf %393, %392 : vector<2x32xf32>
    %395 = arith.divf %393, %394 : vector<2x32xf32>
    %396 = arith.mulf %387, %342 : vector<2x32xf32>
    %397 = arith.mulf %381, %389 : vector<2x32xf32>
    %398 = arith.addf %396, %397 : vector<2x32xf32>
    %399 = math.tanh %398 : vector<2x32xf32>
    %400 = arith.mulf %395, %399 : vector<2x32xf32>
    %401 = arith.truncf %372 : vector<2x32xf32> to vector<2x32xbf16>
    %cst_112 = arith.constant dense<0.000000e+00> : vector<2x128xf32>
    %402 = tpu.matmul %401, %88, %cst_112 {dimension_numbers = #tpu.dot_dimension_numbers<[1], [0], [0], [1], [0, 0, 1, 1], [], []>} : vector<2x32xbf16>, vector<32x128xbf16>, vector<2x128xf32> -> vector<2x128xf32>
    %403 = arith.addf %84, %402 : vector<2x128xf32>
    %404 = vector.extract_strided_slice %403 {offsets = [0, 0], sizes = [2, 32], strides = [1, 1]} : vector<2x128xf32> to vector<2x32xf32>
    %405 = arith.negf %404 : vector<2x32xf32>
    %406 = math.exp %405 : vector<2x32xf32>
    %cst_113 = arith.constant 1.000000e+00 : f32
    %407 = vector.broadcast %cst_113 : f32 to vector<2x32xf32>
    %408 = arith.addf %407, %406 : vector<2x32xf32>
    %409 = arith.divf %407, %408 : vector<2x32xf32>
    %410 = vector.extract_strided_slice %403 {offsets = [0, 32], sizes = [2, 32], strides = [1, 1]} : vector<2x128xf32> to vector<2x32xf32>
    %411 = arith.negf %410 : vector<2x32xf32>
    %412 = math.exp %411 : vector<2x32xf32>
    %cst_114 = arith.constant 1.000000e+00 : f32
    %413 = vector.broadcast %cst_114 : f32 to vector<2x32xf32>
    %414 = arith.addf %413, %412 : vector<2x32xf32>
    %415 = arith.divf %413, %414 : vector<2x32xf32>
    %416 = vector.extract_strided_slice %403 {offsets = [0, 64], sizes = [2, 32], strides = [1, 1]} : vector<2x128xf32> to vector<2x32xf32>
    %417 = math.tanh %416 : vector<2x32xf32>
    %418 = vector.extract_strided_slice %403 {offsets = [0, 96], sizes = [2, 32], strides = [1, 1]} : vector<2x128xf32> to vector<2x32xf32>
    %419 = arith.negf %418 : vector<2x32xf32>
    %420 = math.exp %419 : vector<2x32xf32>
    %cst_115 = arith.constant 1.000000e+00 : f32
    %421 = vector.broadcast %cst_115 : f32 to vector<2x32xf32>
    %422 = arith.addf %421, %420 : vector<2x32xf32>
    %423 = arith.divf %421, %422 : vector<2x32xf32>
    %424 = arith.mulf %415, %370 : vector<2x32xf32>
    %425 = arith.mulf %409, %417 : vector<2x32xf32>
    %426 = arith.addf %424, %425 : vector<2x32xf32>
    %427 = math.tanh %426 : vector<2x32xf32>
    %428 = arith.mulf %423, %427 : vector<2x32xf32>
    %429 = arith.truncf %400 : vector<2x32xf32> to vector<2x32xbf16>
    %cst_116 = arith.constant dense<0.000000e+00> : vector<2x128xf32>
    %430 = tpu.matmul %429, %87, %cst_116 {dimension_numbers = #tpu.dot_dimension_numbers<[1], [0], [0], [1], [0, 0, 1, 1], [], []>} : vector<2x32xbf16>, vector<32x128xbf16>, vector<2x128xf32> -> vector<2x128xf32>
    %431 = arith.addf %77, %430 : vector<2x128xf32>
    %432 = vector.extract_strided_slice %431 {offsets = [0, 0], sizes = [2, 32], strides = [1, 1]} : vector<2x128xf32> to vector<2x32xf32>
    %433 = arith.negf %432 : vector<2x32xf32>
    %434 = math.exp %433 : vector<2x32xf32>
    %cst_117 = arith.constant 1.000000e+00 : f32
    %435 = vector.broadcast %cst_117 : f32 to vector<2x32xf32>
    %436 = arith.addf %435, %434 : vector<2x32xf32>
    %437 = arith.divf %435, %436 : vector<2x32xf32>
    %438 = vector.extract_strided_slice %431 {offsets = [0, 32], sizes = [2, 32], strides = [1, 1]} : vector<2x128xf32> to vector<2x32xf32>
    %439 = arith.negf %438 : vector<2x32xf32>
    %440 = math.exp %439 : vector<2x32xf32>
    %cst_118 = arith.constant 1.000000e+00 : f32
    %441 = vector.broadcast %cst_118 : f32 to vector<2x32xf32>
    %442 = arith.addf %441, %440 : vector<2x32xf32>
    %443 = arith.divf %441, %442 : vector<2x32xf32>
    %444 = vector.extract_strided_slice %431 {offsets = [0, 64], sizes = [2, 32], strides = [1, 1]} : vector<2x128xf32> to vector<2x32xf32>
    %445 = math.tanh %444 : vector<2x32xf32>
    %446 = vector.extract_strided_slice %431 {offsets = [0, 96], sizes = [2, 32], strides = [1, 1]} : vector<2x128xf32> to vector<2x32xf32>
    %447 = arith.negf %446 : vector<2x32xf32>
    %448 = math.exp %447 : vector<2x32xf32>
    %cst_119 = arith.constant 1.000000e+00 : f32
    %449 = vector.broadcast %cst_119 : f32 to vector<2x32xf32>
    %450 = arith.addf %449, %448 : vector<2x32xf32>
    %451 = arith.divf %449, %450 : vector<2x32xf32>
    %452 = arith.mulf %443, %398 : vector<2x32xf32>
    %453 = arith.mulf %437, %445 : vector<2x32xf32>
    %454 = arith.addf %452, %453 : vector<2x32xf32>
    %455 = math.tanh %454 : vector<2x32xf32>
    %456 = arith.mulf %451, %455 : vector<2x32xf32>
    %457 = arith.truncf %428 : vector<2x32xf32> to vector<2x32xbf16>
    %cst_120 = arith.constant dense<0.000000e+00> : vector<2x128xf32>
    %458 = tpu.matmul %457, %88, %cst_120 {dimension_numbers = #tpu.dot_dimension_numbers<[1], [0], [0], [1], [0, 0, 1, 1], [], []>} : vector<2x32xbf16>, vector<32x128xbf16>, vector<2x128xf32> -> vector<2x128xf32>
    %459 = arith.addf %85, %458 : vector<2x128xf32>
    %460 = vector.extract_strided_slice %459 {offsets = [0, 0], sizes = [2, 32], strides = [1, 1]} : vector<2x128xf32> to vector<2x32xf32>
    %461 = arith.negf %460 : vector<2x32xf32>
    %462 = math.exp %461 : vector<2x32xf32>
    %cst_121 = arith.constant 1.000000e+00 : f32
    %463 = vector.broadcast %cst_121 : f32 to vector<2x32xf32>
    %464 = arith.addf %463, %462 : vector<2x32xf32>
    %465 = arith.divf %463, %464 : vector<2x32xf32>
    %466 = vector.extract_strided_slice %459 {offsets = [0, 32], sizes = [2, 32], strides = [1, 1]} : vector<2x128xf32> to vector<2x32xf32>
    %467 = arith.negf %466 : vector<2x32xf32>
    %468 = math.exp %467 : vector<2x32xf32>
    %cst_122 = arith.constant 1.000000e+00 : f32
    %469 = vector.broadcast %cst_122 : f32 to vector<2x32xf32>
    %470 = arith.addf %469, %468 : vector<2x32xf32>
    %471 = arith.divf %469, %470 : vector<2x32xf32>
    %472 = vector.extract_strided_slice %459 {offsets = [0, 64], sizes = [2, 32], strides = [1, 1]} : vector<2x128xf32> to vector<2x32xf32>
    %473 = math.tanh %472 : vector<2x32xf32>
    %474 = vector.extract_strided_slice %459 {offsets = [0, 96], sizes = [2, 32], strides = [1, 1]} : vector<2x128xf32> to vector<2x32xf32>
    %475 = arith.negf %474 : vector<2x32xf32>
    %476 = math.exp %475 : vector<2x32xf32>
    %cst_123 = arith.constant 1.000000e+00 : f32
    %477 = vector.broadcast %cst_123 : f32 to vector<2x32xf32>
    %478 = arith.addf %477, %476 : vector<2x32xf32>
    %479 = arith.divf %477, %478 : vector<2x32xf32>
    %480 = arith.mulf %471, %426 : vector<2x32xf32>
    %481 = arith.mulf %465, %473 : vector<2x32xf32>
    %482 = arith.addf %480, %481 : vector<2x32xf32>
    %483 = math.tanh %482 : vector<2x32xf32>
    %484 = arith.mulf %479, %483 : vector<2x32xf32>
    %485 = arith.truncf %456 : vector<2x32xf32> to vector<2x32xbf16>
    %cst_124 = arith.constant dense<0.000000e+00> : vector<2x128xf32>
    %486 = tpu.matmul %485, %87, %cst_124 {dimension_numbers = #tpu.dot_dimension_numbers<[1], [0], [0], [1], [0, 0, 1, 1], [], []>} : vector<2x32xbf16>, vector<32x128xbf16>, vector<2x128xf32> -> vector<2x128xf32>
    %487 = arith.addf %78, %486 : vector<2x128xf32>
    %488 = vector.extract_strided_slice %487 {offsets = [0, 0], sizes = [2, 32], strides = [1, 1]} : vector<2x128xf32> to vector<2x32xf32>
    %489 = arith.negf %488 : vector<2x32xf32>
    %490 = math.exp %489 : vector<2x32xf32>
    %cst_125 = arith.constant 1.000000e+00 : f32
    %491 = vector.broadcast %cst_125 : f32 to vector<2x32xf32>
    %492 = arith.addf %491, %490 : vector<2x32xf32>
    %493 = arith.divf %491, %492 : vector<2x32xf32>
    %494 = vector.extract_strided_slice %487 {offsets = [0, 32], sizes = [2, 32], strides = [1, 1]} : vector<2x128xf32> to vector<2x32xf32>
    %495 = arith.negf %494 : vector<2x32xf32>
    %496 = math.exp %495 : vector<2x32xf32>
    %cst_126 = arith.constant 1.000000e+00 : f32
    %497 = vector.broadcast %cst_126 : f32 to vector<2x32xf32>
    %498 = arith.addf %497, %496 : vector<2x32xf32>
    %499 = arith.divf %497, %498 : vector<2x32xf32>
    %500 = vector.extract_strided_slice %487 {offsets = [0, 64], sizes = [2, 32], strides = [1, 1]} : vector<2x128xf32> to vector<2x32xf32>
    %501 = math.tanh %500 : vector<2x32xf32>
    %502 = vector.extract_strided_slice %487 {offsets = [0, 96], sizes = [2, 32], strides = [1, 1]} : vector<2x128xf32> to vector<2x32xf32>
    %503 = arith.negf %502 : vector<2x32xf32>
    %504 = math.exp %503 : vector<2x32xf32>
    %cst_127 = arith.constant 1.000000e+00 : f32
    %505 = vector.broadcast %cst_127 : f32 to vector<2x32xf32>
    %506 = arith.addf %505, %504 : vector<2x32xf32>
    %507 = arith.divf %505, %506 : vector<2x32xf32>
    %508 = arith.mulf %499, %454 : vector<2x32xf32>
    %509 = arith.mulf %493, %501 : vector<2x32xf32>
    %510 = arith.addf %508, %509 : vector<2x32xf32>
    %511 = math.tanh %510 : vector<2x32xf32>
    %512 = arith.mulf %507, %511 : vector<2x32xf32>
    %513 = arith.truncf %484 : vector<2x32xf32> to vector<2x32xbf16>
    %cst_128 = arith.constant dense<0.000000e+00> : vector<2x128xf32>
    %514 = tpu.matmul %513, %88, %cst_128 {dimension_numbers = #tpu.dot_dimension_numbers<[1], [0], [0], [1], [0, 0, 1, 1], [], []>} : vector<2x32xbf16>, vector<32x128xbf16>, vector<2x128xf32> -> vector<2x128xf32>
    %515 = arith.addf %86, %514 : vector<2x128xf32>
    %516 = vector.extract_strided_slice %515 {offsets = [0, 0], sizes = [2, 32], strides = [1, 1]} : vector<2x128xf32> to vector<2x32xf32>
    %517 = arith.negf %516 : vector<2x32xf32>
    %518 = math.exp %517 : vector<2x32xf32>
    %cst_129 = arith.constant 1.000000e+00 : f32
    %519 = vector.broadcast %cst_129 : f32 to vector<2x32xf32>
    %520 = arith.addf %519, %518 : vector<2x32xf32>
    %521 = arith.divf %519, %520 : vector<2x32xf32>
    %522 = vector.extract_strided_slice %515 {offsets = [0, 32], sizes = [2, 32], strides = [1, 1]} : vector<2x128xf32> to vector<2x32xf32>
    %523 = arith.negf %522 : vector<2x32xf32>
    %524 = math.exp %523 : vector<2x32xf32>
    %cst_130 = arith.constant 1.000000e+00 : f32
    %525 = vector.broadcast %cst_130 : f32 to vector<2x32xf32>
    %526 = arith.addf %525, %524 : vector<2x32xf32>
    %527 = arith.divf %525, %526 : vector<2x32xf32>
    %528 = vector.extract_strided_slice %515 {offsets = [0, 64], sizes = [2, 32], strides = [1, 1]} : vector<2x128xf32> to vector<2x32xf32>
    %529 = math.tanh %528 : vector<2x32xf32>
    %530 = vector.extract_strided_slice %515 {offsets = [0, 96], sizes = [2, 32], strides = [1, 1]} : vector<2x128xf32> to vector<2x32xf32>
    %531 = arith.negf %530 : vector<2x32xf32>
    %532 = math.exp %531 : vector<2x32xf32>
    %cst_131 = arith.constant 1.000000e+00 : f32
    %533 = vector.broadcast %cst_131 : f32 to vector<2x32xf32>
    %534 = arith.addf %533, %532 : vector<2x32xf32>
    %535 = arith.divf %533, %534 : vector<2x32xf32>
    %536 = arith.mulf %527, %482 : vector<2x32xf32>
    %537 = arith.mulf %521, %529 : vector<2x32xf32>
    %538 = arith.addf %536, %537 : vector<2x32xf32>
    %539 = math.tanh %538 : vector<2x32xf32>
    %540 = arith.mulf %535, %539 : vector<2x32xf32>
    %c0_132 = arith.constant 0 : index
    %c0_133 = arith.constant 0 : index
    %c0_134 = arith.constant 0 : index
    %541 = vector.load %arg15[%c0_132, %c0_133, %c0_134] : memref<2x2x32xf32, #tpu.memory_space<vmem>>, vector<1x2x32xf32>
    %542 = vector.shape_cast %541 : vector<1x2x32xf32> to vector<2x32xf32>
    %543 = vector.shape_cast %512 : vector<2x32xf32> to vector<1x2x32xf32>
    tpu.vector_store %arg15[%c0_132, %c0_133, %c0_134], %543 {strides = array<i32>} : memref<2x2x32xf32, #tpu.memory_space<vmem>>, vector<1x2x32xf32>,
    %c1_135 = arith.constant 1 : index
    %c0_136 = arith.constant 0 : index
    %c0_137 = arith.constant 0 : index
    %544 = vector.load %arg15[%c1_135, %c0_136, %c0_137] : memref<2x2x32xf32, #tpu.memory_space<vmem>>, vector<1x2x32xf32>
    %545 = vector.shape_cast %544 : vector<1x2x32xf32> to vector<2x32xf32>
    %546 = vector.shape_cast %540 : vector<2x32xf32> to vector<1x2x32xf32>
    tpu.vector_store %arg15[%c1_135, %c0_136, %c0_137], %546 {strides = array<i32>} : memref<2x2x32xf32, #tpu.memory_space<vmem>>, vector<1x2x32xf32>,
    %c0_138 = arith.constant 0 : index
    %c0_139 = arith.constant 0 : index
    %c0_140 = arith.constant 0 : index
    %547 = vector.load %arg16[%c0_138, %c0_139, %c0_140] : memref<2x2x32xf32, #tpu.memory_space<vmem>>, vector<1x2x32xf32>
    %548 = vector.shape_cast %547 : vector<1x2x32xf32> to vector<2x32xf32>
    %549 = vector.shape_cast %510 : vector<2x32xf32> to vector<1x2x32xf32>
    tpu.vector_store %arg16[%c0_138, %c0_139, %c0_140], %549 {strides = array<i32>} : memref<2x2x32xf32, #tpu.memory_space<vmem>>, vector<1x2x32xf32>,
    %c1_141 = arith.constant 1 : index
    %c0_142 = arith.constant 0 : index
    %c0_143 = arith.constant 0 : index
    %550 = vector.load %arg16[%c1_141, %c0_142, %c0_143] : memref<2x2x32xf32, #tpu.memory_space<vmem>>, vector<1x2x32xf32>
    %551 = vector.shape_cast %550 : vector<1x2x32xf32> to vector<2x32xf32>
    %552 = vector.shape_cast %538 : vector<2x32xf32> to vector<1x2x32xf32>
    tpu.vector_store %arg16[%c1_141, %c0_142, %c0_143], %552 {strides = array<i32>} : memref<2x2x32xf32, #tpu.memory_space<vmem>>, vector<1x2x32xf32>,
    %553 = tpu.concatenate %120, %540 in 1 : vector<2x32xf32>, vector<2x32xf32> -> vector<2x64xf32>
    %554 = tpu.concatenate %176, %484 in 1 : vector<2x32xf32>, vector<2x32xf32> -> vector<2x64xf32>
    %555 = tpu.concatenate %232, %428 in 1 : vector<2x32xf32>, vector<2x32xf32> -> vector<2x64xf32>
    %556 = tpu.concatenate %288, %372 in 1 : vector<2x32xf32>, vector<2x32xf32> -> vector<2x64xf32>
    %557 = tpu.concatenate %344, %316 in 1 : vector<2x32xf32>, vector<2x32xf32> -> vector<2x64xf32>
    %558 = tpu.concatenate %400, %260 in 1 : vector<2x32xf32>, vector<2x32xf32> -> vector<2x64xf32>
    %559 = tpu.concatenate %456, %204 in 1 : vector<2x32xf32>, vector<2x32xf32> -> vector<2x64xf32>
    %560 = tpu.concatenate %512, %148 in 1 : vector<2x32xf32>, vector<2x32xf32> -> vector<2x64xf32>
    %561 = tpu.concatenate %553, %554, %555, %556, %557, %558, %559, %560 in 0 : vector<2x64xf32>, vector<2x64xf32>, vector<2x64xf32>, vector<2x64xf32>, vector<2x64xf32>, vector<2x64xf32>, vector<2x64xf32>, vector<2x64xf32> -> vector<16x64xf32>
    %562 = arith.truncf %561 : vector<16x64xf32> to vector<16x64xbf16>
    %c0_144 = arith.constant 0 : index
    %c0_145 = arith.constant 0 : index
    %563 = vector.load %arg6[%c0_144, %c0_145] : memref<64x32xbf16, #tpu.memory_space<vmem>>, vector<64x32xbf16>
    %cst_146 = arith.constant dense<0.000000e+00> : vector<16x32xf32>
    %564 = tpu.matmul %562, %563, %cst_146 {dimension_numbers = #tpu.dot_dimension_numbers<[1], [0], [0], [1], [0, 0, 1, 1], [], []>} : vector<16x64xbf16>, vector<64x32xbf16>, vector<16x32xf32> -> vector<16x32xf32>
    %c0_147 = arith.constant 0 : index
    %c0_148 = arith.constant 0 : index
    %565 = vector.load %arg7[%c0_147, %c0_148] : memref<1x32xf32, #tpu.memory_space<vmem>>, vector<1x32xf32>
    %566 = vector.broadcast %565 : vector<1x32xf32> to vector<16x32xf32>
    %567 = arith.addf %564, %566 : vector<16x32xf32>
    %568 = arith.addf %567, %64 : vector<16x32xf32>
    %cst_149 = arith.constant 0.707106769 : f32
    %569 = vector.broadcast %cst_149 : f32 to vector<16x32xf32>
    %570 = arith.mulf %568, %569 : vector<16x32xf32>
    %571 = arith.mulf %570, %570 : vector<16x32xf32>
    %cst_150 = arith.constant dense<0.000000e+00> : vector<16xf32>
    %572 = vector.multi_reduction <add>, %571, %cst_150 [1] : vector<16x32xf32> to vector<16xf32>
    %573 = vector.shape_cast %572 : vector<16xf32> to vector<16x1xf32>
    %cst_151 = arith.constant 1.000000e-24 : f32
    %574 = vector.broadcast %cst_151 : f32 to vector<16x1xf32>
    %575 = arith.maximumf %573, %574 : vector<16x1xf32>
    %576 = math.rsqrt %575 : vector<16x1xf32>
    %577 = vector.broadcast %576 : vector<16x1xf32> to vector<16x32xf32>
    %578 = arith.mulf %570, %577 : vector<16x32xf32>
    %579 = vector.extract_strided_slice %578 {offsets = [0, 0], sizes = [2, 32], strides = [1, 1]} : vector<16x32xf32> to vector<2x32xf32>
    %580 = vector.extract_strided_slice %578 {offsets = [2, 0], sizes = [2, 32], strides = [1, 1]} : vector<16x32xf32> to vector<2x32xf32>
    %581 = vector.extract_strided_slice %578 {offsets = [4, 0], sizes = [2, 32], strides = [1, 1]} : vector<16x32xf32> to vector<2x32xf32>
    %582 = vector.extract_strided_slice %578 {offsets = [6, 0], sizes = [2, 32], strides = [1, 1]} : vector<16x32xf32> to vector<2x32xf32>
    %583 = vector.extract_strided_slice %578 {offsets = [8, 0], sizes = [2, 32], strides = [1, 1]} : vector<16x32xf32> to vector<2x32xf32>
    %584 = vector.extract_strided_slice %578 {offsets = [10, 0], sizes = [2, 32], strides = [1, 1]} : vector<16x32xf32> to vector<2x32xf32>
    %585 = vector.extract_strided_slice %578 {offsets = [12, 0], sizes = [2, 32], strides = [1, 1]} : vector<16x32xf32> to vector<2x32xf32>
    %586 = vector.extract_strided_slice %578 {offsets = [14, 0], sizes = [2, 32], strides = [1, 1]} : vector<16x32xf32> to vector<2x32xf32>
    %c0_152 = arith.constant 0 : index
    %c0_153 = arith.constant 0 : index
    %587 = vector.load %arg14[%c0_152, %c0_153] : memref<2x256xf32, #tpu.memory_space<vmem>>, vector<2x32xf32>
    tpu.vector_store %arg14[%c0_152, %c0_153], %579 {strides = array<i32>} : memref<2x256xf32, #tpu.memory_space<vmem>>, vector<2x32xf32>,
    %c0_154 = arith.constant 0 : index
    %c32 = arith.constant 32 : index
    %588 = vector.load %arg14[%c0_154, %c32] : memref<2x256xf32, #tpu.memory_space<vmem>>, vector<2x32xf32>
    tpu.vector_store %arg14[%c0_154, %c32], %580 {strides = array<i32>} : memref<2x256xf32, #tpu.memory_space<vmem>>, vector<2x32xf32>,
    %c0_155 = arith.constant 0 : index
    %c64 = arith.constant 64 : index
    %589 = vector.load %arg14[%c0_155, %c64] : memref<2x256xf32, #tpu.memory_space<vmem>>, vector<2x32xf32>
    tpu.vector_store %arg14[%c0_155, %c64], %581 {strides = array<i32>} : memref<2x256xf32, #tpu.memory_space<vmem>>, vector<2x32xf32>,
    %c0_156 = arith.constant 0 : index
    %c96 = arith.constant 96 : index
    %590 = vector.load %arg14[%c0_156, %c96] : memref<2x256xf32, #tpu.memory_space<vmem>>, vector<2x32xf32>
    tpu.vector_store %arg14[%c0_156, %c96], %582 {strides = array<i32>} : memref<2x256xf32, #tpu.memory_space<vmem>>, vector<2x32xf32>,
    %c0_157 = arith.constant 0 : index
    %c128 = arith.constant 128 : index
    %591 = vector.load %arg14[%c0_157, %c128] : memref<2x256xf32, #tpu.memory_space<vmem>>, vector<2x32xf32>
    tpu.vector_store %arg14[%c0_157, %c128], %583 {strides = array<i32>} : memref<2x256xf32, #tpu.memory_space<vmem>>, vector<2x32xf32>,
    %c0_158 = arith.constant 0 : index
    %c160 = arith.constant 160 : index
    %592 = vector.load %arg14[%c0_158, %c160] : memref<2x256xf32, #tpu.memory_space<vmem>>, vector<2x32xf32>
    tpu.vector_store %arg14[%c0_158, %c160], %584 {strides = array<i32>} : memref<2x256xf32, #tpu.memory_space<vmem>>, vector<2x32xf32>,
    %c0_159 = arith.constant 0 : index
    %c192 = arith.constant 192 : index
    %593 = vector.load %arg14[%c0_159, %c192] : memref<2x256xf32, #tpu.memory_space<vmem>>, vector<2x32xf32>
    tpu.vector_store %arg14[%c0_159, %c192], %585 {strides = array<i32>} : memref<2x256xf32, #tpu.memory_space<vmem>>, vector<2x32xf32>,
    %c0_160 = arith.constant 0 : index
    %c224 = arith.constant 224 : index
    %594 = vector.load %arg14[%c0_160, %c224] : memref<2x256xf32, #tpu.memory_space<vmem>>, vector<2x32xf32>
    tpu.vector_store %arg14[%c0_160, %c224], %586 {strides = array<i32>} : memref<2x256xf32, #tpu.memory_space<vmem>>, vector<2x32xf32>,
    %595 = arith.addf %579, %580 : vector<2x32xf32>
    %596 = arith.addf %581, %582 : vector<2x32xf32>
    %597 = arith.addf %583, %584 : vector<2x32xf32>
    %598 = arith.addf %585, %586 : vector<2x32xf32>
    %599 = arith.addf %595, %596 : vector<2x32xf32>
    %600 = arith.addf %597, %598 : vector<2x32xf32>
    %601 = arith.addf %599, %600 : vector<2x32xf32>
    %cst_161 = arith.constant 1.250000e-01 : f32
    %602 = vector.broadcast %cst_161 : f32 to vector<2x32xf32>
    %603 = arith.mulf %601, %602 : vector<2x32xf32>
    %604 = arith.mulf %603, %603 : vector<2x32xf32>
    %cst_162 = arith.constant dense<0.000000e+00> : vector<2xf32>
    %605 = vector.multi_reduction <add>, %604, %cst_162 [1] : vector<2x32xf32> to vector<2xf32>
    %606 = vector.shape_cast %605 : vector<2xf32> to vector<2x1xf32>
    %cst_163 = arith.constant 1.000000e-24 : f32
    %607 = vector.broadcast %cst_163 : f32 to vector<2x1xf32>
    %608 = arith.maximumf %606, %607 : vector<2x1xf32>
    %609 = math.rsqrt %608 : vector<2x1xf32>
    %610 = vector.broadcast %609 : vector<2x1xf32> to vector<2x32xf32>
    %611 = arith.mulf %603, %610 : vector<2x32xf32>
    %c0_164 = arith.constant 0 : index
    %c0_165 = arith.constant 0 : index
    %612 = vector.load %arg17[%c0_164, %c0_165] : memref<2x32xf32, #tpu.memory_space<vmem>>, vector<2x32xf32>
    tpu.vector_store %arg17[%c0_164, %c0_165], %611 {strides = array<i32>} : memref<2x32xf32, #tpu.memory_space<vmem>>, vector<2x32xf32>,
    %613 = arith.truncf %611 : vector<2x32xf32> to vector<2x32xbf16>
    %c0_166 = arith.constant 0 : index
    %c0_167 = arith.constant 0 : index
    %614 = vector.load %arg8[%c0_166, %c0_167] : memref<32x32xbf16, #tpu.memory_space<vmem>>, vector<32x32xbf16>
    %cst_168 = arith.constant dense<0.000000e+00> : vector<2x32xf32>
    %615 = tpu.matmul %613, %614, %cst_168 {dimension_numbers = #tpu.dot_dimension_numbers<[1], [0], [0], [1], [0, 0, 1, 1], [], []>} : vector<2x32xbf16>, vector<32x32xbf16>, vector<2x32xf32> -> vector<2x32xf32>
    %c0_169 = arith.constant 0 : index
    %c0_170 = arith.constant 0 : index
    %616 = vector.load %arg9[%c0_169, %c0_170] : memref<1x32xf32, #tpu.memory_space<vmem>>, vector<1x32xf32>
    %617 = vector.broadcast %616 : vector<1x32xf32> to vector<2x32xf32>
    %618 = arith.addf %615, %617 : vector<2x32xf32>
    %cst_171 = arith.constant 0.000000e+00 : f32
    %619 = vector.broadcast %cst_171 : f32 to vector<2x32xf32>
    %620 = arith.maximumf %618, %619 : vector<2x32xf32>
    %621 = arith.truncf %620 : vector<2x32xf32> to vector<2x32xbf16>
    %c0_172 = arith.constant 0 : index
    %c0_173 = arith.constant 0 : index
    %622 = vector.load %arg10[%c0_172, %c0_173] : memref<32x32xbf16, #tpu.memory_space<vmem>>, vector<32x32xbf16>
    %cst_174 = arith.constant dense<0.000000e+00> : vector<2x32xf32>
    %623 = tpu.matmul %621, %622, %cst_174 {dimension_numbers = #tpu.dot_dimension_numbers<[1], [0], [0], [1], [0, 0, 1, 1], [], []>} : vector<2x32xbf16>, vector<32x32xbf16>, vector<2x32xf32> -> vector<2x32xf32>
    %c0_175 = arith.constant 0 : index
    %c0_176 = arith.constant 0 : index
    %624 = vector.load %arg11[%c0_175, %c0_176] : memref<1x32xf32, #tpu.memory_space<vmem>>, vector<1x32xf32>
    %625 = vector.broadcast %624 : vector<1x32xf32> to vector<2x32xf32>
    %626 = arith.addf %623, %625 : vector<2x32xf32>
    %cst_177 = arith.constant 0.000000e+00 : f32
    %627 = vector.broadcast %cst_177 : f32 to vector<2x32xf32>
    %628 = arith.maximumf %626, %627 : vector<2x32xf32>
    %629 = arith.addf %611, %628 : vector<2x32xf32>
    %cst_178 = arith.constant 0.707106769 : f32
    %630 = vector.broadcast %cst_178 : f32 to vector<2x32xf32>
    %631 = arith.mulf %629, %630 : vector<2x32xf32>
    %632 = arith.truncf %631 : vector<2x32xf32> to vector<2x32xbf16>
    %c0_179 = arith.constant 0 : index
    %c0_180 = arith.constant 0 : index
    %633 = vector.load %arg12[%c0_179, %c0_180] : memref<32x1xbf16, #tpu.memory_space<vmem>>, vector<32x1xbf16>
    %cst_181 = arith.constant dense<0.000000e+00> : vector<2x1xf32>
    %634 = tpu.matmul %632, %633, %cst_181 {dimension_numbers = #tpu.dot_dimension_numbers<[1], [0], [0], [1], [0, 0, 1, 1], [], []>} : vector<2x32xbf16>, vector<32x1xbf16>, vector<2x1xf32> -> vector<2x1xf32>
    %c0_182 = arith.constant 0 : index
    %c0_183 = arith.constant 0 : index
    %635 = vector.load %arg13[%c0_182, %c0_183] : memref<1x1xf32, #tpu.memory_space<vmem>>, vector<1x1xf32>
    %636 = vector.broadcast %635 : vector<1x1xf32> to vector<2x1xf32>
    %637 = arith.addf %634, %636 : vector<2x1xf32>
    %638 = arith.negf %637 : vector<2x1xf32>
    %639 = math.exp %638 : vector<2x1xf32>
    %cst_184 = arith.constant 1.000000e+00 : f32
    %640 = vector.broadcast %cst_184 : f32 to vector<2x1xf32>
    %641 = arith.addf %640, %639 : vector<2x1xf32>
    %642 = arith.divf %640, %641 : vector<2x1xf32>
    %c0_185 = arith.constant 0 : index
    %c0_186 = arith.constant 0 : index
    %643 = vector.load %arg18[%c0_185, %c0_186] : memref<2x1xf32, #tpu.memory_space<vmem>>, vector<2x1xf32>
    tpu.vector_store %arg18[%c0_185, %c0_186], %642 {strides = array<i32>} : memref<2x1xf32, #tpu.memory_space<vmem>>, vector<2x1xf32>,
    return
  }
}

</mosaic_0001>

<bundles_post_ra>
// kernel: encoder_forward.1
= control target key start
LH: loop header
LB: loop body
LE: loop exit
PB: predicated region body
PF: predicated region fallthrough
CT: control target
= control target key end

     0   :  { %s3651_s0 = inlined_call_operand.vmem [shape: s32[2,8], index: 0, kind: input, shape index: {}]   ;;  %s3652_s1 = inlined_call_operand.hbm [shape: f32[12,1,32], index: 1, kind: input, shape index: {}]   ;;  %s3653_s2 = inlined_call_operand.vmem [shape: bf16[32,256], index: 2, kind: input, shape index: {}]   ;;  %s3654_s3 = inlined_call_operand.vmem [shape: bf16[32,128], index: 3, kind: input, shape index: {}]   ;;  %s3655_s4 = inlined_call_operand.vmem [shape: bf16[32,128], index: 4, kind: input, shape index: {}]   ;;  %s3656_s5 = inlined_call_operand.hbm [shape: f32[1,256], index: 5, kind: input, shape index: {}]   ;;  %s3657_s6 = inlined_call_operand.vmem [shape: bf16[64,32], index: 6, kind: input, shape index: {}]   ;;  %s3658_s7 = inlined_call_operand.hbm [shape: f32[1,32], index: 7, kind: input, shape index: {}]   ;;  %s3659_s8 = inlined_call_operand.hbm [shape: bf16[32,32], index: 8, kind: input, shape index: {}]   ;;  %s3660_s9 = inlined_call_operand.vmem [shape: f32[1,32], index: 9, kind: input, shape index: {}]   ;;  %s3661_s10 = inlined_call_operand.vmem [shape: bf16[32,32], index: 10, kind: input, shape index: {}]   ;;  %s3662_s11 = inlined_call_operand.vmem [shape: f32[1,32], index: 11, kind: input, shape index: {}]   ;;  %s3663_s12 = inlined_call_operand.vmem [shape: bf16[32,1], index: 12, kind: input, shape index: {}]   ;;  %s3664_s13 = inlined_call_operand.<no memory space> [shape: f32[1,1], index: 13, kind: input, shape index: {}]   ;;  %s3665_s14 = inlined_call_operand.vmem [shape: f32[2,256], index: 14, kind: output, shape index: {0}]   ;;  %s3666_s15 = inlined_call_operand.hbm [shape: f32[2,2,32], index: 15, kind: output, shape index: {1}]   ;;  %s3667_s16 = inlined_call_operand.hbm [shape: f32[2,2,32], index: 16, kind: output, shape index: {2}]   ;;  %s3668_s17 = inlined_call_operand.hbm [shape: f32[2,32], index: 17, kind: output, shape index: {3}]   ;;  %s3669_s18 = inlined_call_operand.vmem [shape: f32[2,1], index: 18, kind: output, shape index: {4}]  }
   0x1   :  { %3672 = sst [smem:[#allocation23_spill]] %s3651_s0  ;;  %v24_v0 = vstv %s3664_s13 }
   0x2   :  { %3673 = sst [smem:[#allocation24_spill]] %s3652_s1  ;;  %25 = vst [vmem:[#allocation2] sm:$0x1] %v24_v0 }
   0x3   :  { %3674 = sst [smem:[#allocation25_spill]] %s3653_s2 }
   0x4   :  { %26 = vsyncpa [#allocation6], 0 }
   0x5   :  { %27 = vsyncpa [#allocation4], 0 }
   0x6   :  { %28 = vsyncpa [#allocation9], 0 }
   0x7   :  { %29 = vsyncpa [#allocation12], 0 }
   0x8   :  { %30 = vsyncpa [#allocation5], 0 }
   0x9   :  { %31 = vsyncpa [#allocation15], 0  ;;  %s3675_s0 = sld [smem:[#allocation23_spill]]  ;;  %s2900_s1 = smov [#allocation8]  }
   0xa   :  { %s66_s20 = sshll.u32 %s2900_s1, 4  ;;  %s2722_s2 = scalar_lea.hbm %s3656_s5, 32  ;;  %s67_s20 = int_to_ptr.vmem [resolvable:$true] %s66_s20 }
   0xb   :  { %p2723_p0 = scmp.ne.s32.totalorder %s3656_s5, %s2722_s2  ;;  %p2726_p1 = scmp.lt.u32.totalorder %s2722_s2, %s3656_s5 }
   0xd   :  { %p2728_p2 = pnand %p2726_p1, %p2723_p0 }
   0xf   :  { %s38_s19 = sshll.u32 %s3675_s0, 4  ;;  %s39_s19 = int_to_ptr.vmem [resolvable:$true] %s38_s19 }
  0x10   :  { %2731 = shalt.err (!%p2728_p2)
}
  0x11   :  { %s2732_s26 = scalar_lea.vmem %s67_s20, 32  ;;  %p2737_p4 = scmp.lt.s32.totalorder %s67_s20, %s67_s20 }
  0x12   :  { %p2733_p3 = scmp.ne.s32.totalorder %s67_s20, %s2732_s26  ;;  %p2738_p5 = scmp.lt.s32.totalorder %s2732_s26, %s2732_s26 }
  0x14   :  { %p2739_p6 = por %p2738_p5, %p2737_p4 }
  0x16   :  { %p2740_p7 = pnand %p2739_p6, %p2733_p3 }
  0x18   :  { %2743 = shalt.err (!%p2740_p7)
}
  0x19   :  { %69 = dma.hbm_to_vmem [thread:$0]  %s3656_s5, 32, %s67_s20, [#allocation9]  }
  0x1a   :  { %s2744_s29 = scalar_lea.vmem %s39_s19, 32  ;;  %p2749_p9 = scmp.lt.s32.totalorder %s39_s19, %s39_s19 }
  0x1b   :  { %p2745_p8 = scmp.ne.s32.totalorder %s39_s19, %s2744_s29  ;;  %p2750_p10 = scmp.lt.s32.totalorder %s2744_s29, %s2744_s29 }
  0x1d   :  { %p2751_p11 = por %p2750_p10, %p2749_p9 }
  0x1f   :  { %p2752_p12 = pnand %p2751_p11, %p2745_p8 }
  0x21   :  { %2755 = shalt.err (!%p2752_p12)
}
  0x22   :  { %s2901_s30 = smov [#allocation3]   ;;  %s2902_s0 = smov [#allocation7]  }
  0x23   :  { %41 = dma.vmem_to_smem %s39_s19, 32, %s2901_s30, [#allocation6]  }
  0x24   :  { %s47_s1 = sshll.u32 %s2902_s0, 4  ;;  %s3676_s2 = sld [smem:[#allocation24_spill]]  ;;  %s48_s1 = int_to_ptr.vmem [resolvable:$true] %s47_s1 }
  0x2a   :  { %s2756_s13 = scalar_lea.hbm %s3676_s2, 192 }
  0x2b   :  { %p2757_p13 = scmp.ne.s32.totalorder %s3676_s2, %s2756_s13  ;;  %p2760_p0 = scmp.lt.u32.totalorder %s2756_s13, %s3676_s2 }
  0x2d   :  { %p2762_p1 = pnand %p2760_p0, %p2757_p13 }
  0x2f   :  { %2765 = shalt.err (!%p2762_p1)
}
  0x30   :  { %s2766_s25 = scalar_lea.vmem %s48_s1, 192  ;;  %p2771_p3 = scmp.lt.s32.totalorder %s48_s1, %s48_s1 }
  0x31   :  { %p2767_p2 = scmp.ne.s32.totalorder %s48_s1, %s2766_s25  ;;  %p2772_p4 = scmp.lt.s32.totalorder %s2766_s25, %s2766_s25 }
  0x33   :  { %p2773_p5 = por %p2772_p4, %p2771_p3 }
  0x35   :  { %p2774_p6 = pnand %p2773_p5, %p2767_p2 }
  0x37   :  { %2777 = shalt.err (!%p2774_p6)
}
  0x38   :  { %s2903_s19 = smov 16   ;;  %s2904_s26 = smov 1  }
  0x39   :  { %53 = dma.hbm_to_vmem [thread:$0]  %s3676_s2, 192, %s48_s1, [#allocation4], %s2903_s19, %s2903_s19, %s2904_s26  }
  0x3a   :  { %s2905_s29 = smov [#allocation10]   ;;  %s2906_s0 = smov [#allocation11]  }
  0x3b   :  { %s78_s30 = sshll.u32 %s2905_s29, 4  ;;  %s87_s21 = sshll.u32 %s2906_s0, 4  ;;  %s79_s30 = int_to_ptr.vmem [resolvable:$true] %s78_s30  ;;  %s88_s21 = int_to_ptr.vmem [resolvable:$true] %s87_s21 }
  0x3c   :  { %s2778_s23 = scalar_lea.hbm %s3658_s7, 16 }
  0x3d   :  { %p2779_p7 = scmp.ne.s32.totalorder %s3658_s7, %s2778_s23  ;;  %p2782_p8 = scmp.lt.u32.totalorder %s2778_s23, %s3658_s7 }
  0x3f   :  { %p2784_p9 = pnand %p2782_p8, %p2779_p7 }
  0x41   :  { %2787 = shalt.err (!%p2784_p9)
}
  0x42   :  { %s2788_s1 = scalar_lea.vmem %s79_s30, 16  ;;  %s2792_s2 = scalar_lea.vmem %s79_s30, 32 }
  0x43   :  { %p2789_p10 = scmp.ne.s32.totalorder %s79_s30, %s2788_s1  ;;  %p2793_p11 = scmp.lt.s32.totalorder %s79_s30, %s79_s30 }
  0x44   :  { %p2794_p12 = scmp.lt.s32.totalorder %s2792_s2, %s2788_s1 }
  0x46   :  { %p2795_p13 = por %p2794_p12, %p2793_p11 }
  0x48   :  { %p2796_p0 = pnand %p2795_p13, %p2789_p10 }
  0x4a   :  { %2799 = shalt.err (!%p2796_p0)
}
  0x4b   :  { %81 = dma.hbm_to_vmem [thread:$0]  %s3658_s7, 16, %s79_s30, [#allocation9]  }
  0x4c   :  { %s2800_s29 = scalar_lea.hbm %s3659_s8, 256 }
  0x4d   :  { %p2801_p1 = scmp.ne.s32.totalorder %s3659_s8, %s2800_s29  ;;  %p2804_p2 = scmp.lt.u32.totalorder %s2800_s29, %s3659_s8 }
  0x4f   :  { %p2806_p3 = pnand %p2804_p2, %p2801_p1 }
  0x51   :  { %2809 = shalt.err (!%p2806_p3)
}
  0x52   :  { %s2810_s24 = scalar_lea.vmem %s88_s21, 256  ;;  %p2815_p5 = scmp.lt.s32.totalorder %s88_s21, %s88_s21 }
  0x53   :  { %p2811_p4 = scmp.ne.s32.totalorder %s88_s21, %s2810_s24  ;;  %p2816_p6 = scmp.lt.s32.totalorder %s2810_s24, %s2810_s24 }
  0x55   :  { %p2817_p7 = por %p2816_p6, %p2815_p5 }
  0x57   :  { %p2818_p8 = pnand %p2817_p7, %p2811_p4 }
  0x59   :  { %2821 = shalt.err (!%p2818_p8)
}
  0x5a   :  { %s2907_s7 = smov 64   ;;  %s2908_s30 = smov 4  }
  0x5b   :  { %93 = dma.hbm_to_vmem [thread:$0]  %s3659_s8, 256, %s88_s21, [#allocation12], %s2907_s7, %s2907_s7, %s2908_s30  }
  0x5c   :  { %2888 = dma.done.wait [#allocation6], 32  }
  0x5d   :  { %2889 = vsyncadd [#allocation6], 4294967264 }
  0x5e   :  { %2890 = dma.done.wait [#allocation4], 192  }
  0x5f   :  { %2891 = vsyncadd [#allocation4], 4294967104 }
  0x60   :  { %2892 = dma.done.wait [#allocation9], 48  }
  0x61   :  { %2893 = vsyncadd [#allocation9], 4294967248 }
  0x62   :  { %2894 = dma.done.wait [#allocation12], 256  }
  0x63   :  { %2895 = vsyncadd [#allocation12], 4294967040 }
  0x64   :  { %119 = sfence }
  0x65   :  { %s3677_s2 = sld [smem:[#allocation25_spill]]  ;;  %v2909_v3 = vmov 0.0   ;;  %v2910_v4 = vmov 0   ;;  %s121_s8 = sld [smem:[#allocation3]]  ;;  %v3084_v6 = vld [vmem:[%s3654_s3] sm:$0xff]   ;;  %v3093_v8 = vld [vmem:[%s3654_s3 + $0x8] sm:$0xff]   ;;  %v281_v46 = vlaneseq }
  0x66   :  { %2344 = vmatprep.subr.bf16.mxu1 %v2909_v3  ;;  %347 = vmatprep.mubr.bf16.mxu0 %v2910_v4  ;;  %s2195_s13 = sld [smem:[#allocation3 + $0x80]]  ;;  %s2196_s30 = sld [smem:[#allocation3 + $0x1]]  ;;  %vm253_vm0 = vcmask 1040384   ;;  %vm255_vm1 = vcmask 1041408   ;;  %vm257_vm2 = vcmask 1042432   ;;  %vm2911_vm3 = vmmov 0  }
  0x67   :  { %2345 = vmatpush3.bf16.msra.mxu1 %v3084_v6  ;;  %s2197_s5 = sld [smem:[#allocation3 + $0x81]]  ;;  %s3096_s20 = sld [smem:[#allocation3 + $0x2]]  ;;  %2348 = vmatprep.mubr.msk.bf16.mxu1 %vm2911_vm3, %v2909_v3  ;;  %vm259_vm4 = vcmask 1043456   ;;  %vm261_vm5 = vcmask 1044480   ;;  %vm263_vm6 = vcmask 1045504   ;;  %vm265_vm7 = vcmask 1046528  }
  0x68   :  { %2346 = vmatprep.subr.bf16.mxu1 %v2909_v3  ;;  %s3098_s25 = sld [smem:[#allocation3 + $0x82]]  ;;  %s3100_s1 = sld [smem:[#allocation3 + $0x3]]  ;;  %vm311_vm8 = vcmask 261120   ;;  %v3147_v39 = vld [vmem:[%s3655_s4] sm:$0xff]   ;;  %v3156_v41 = vld [vmem:[%s3655_s4 + $0x8] sm:$0xff]   ;;  %v3170_v47 = vshrl.u32 %v281_v46, 7 }
  0x69   :  { %s3103_s19 = sld [smem:[#allocation3 + $0x83]]  ;;  %s2202_s26 = sld [smem:[#allocation3 + $0x4]]  ;;  %v279_v49 = vld [vmem:[#allocation8] sm:$0x3]  ;;  %vm1624_vm9 = vcmask 261126   ;;  %vm1757_vm10 = vcmask 523264  }
  0x6a   :  { %s2203_s21 = sld [smem:[#allocation3 + $0x84]]  ;;  %s3106_s27 = sld [smem:[#allocation3 + $0x5]]  ;;  %v287_v48 = vsub.s32 1, %v3170_v47  ;;  %v283_v50 = vsub.s32 0, %v3170_v47  ;;  %vm1631_vm11 = vcmask 254976   ;;  %vm1833_vm12 = vcmask 517376  }
  0x6b   :  { %v2562_v1 = vld [vmem:[%s3677_s2 + $0x4] ss:$8 sps:$4 sm:$0xff]   ;;  %v2564_v2 = vld [vmem:[%s3677_s2] ss:$8 sps:$4 sm:$0xff]   ;;  %v2565_v5 = vld [vmem:[%s3677_s2 + $0x14] ss:$8 sps:$4 sm:$0xff]   ;;  %2347 = vmatpush3.bf16.msra.mxu1 %v3093_v8 }
  0x6c   :  { %315 = vmatprep.subr.bf16.mxu0 %v2562_v1  ;;  %v2568_v7 = vld [vmem:[%s3677_s2 + $0x10] ss:$8 sps:$4 sm:$0xff]   ;;  %s122_s2 = scalar_lea.vmem [#allocation7], %s121_s8  ;;  %s3108_s28 = sld [smem:[#allocation3 + $0x85]]  ;;  %2360 = vmatprep.subr.bf16.mxu1 %v2909_v3  ;;  %v288_v51 = vrot.slane %v279_v49, %v287_v48  ;;  %v284_v53 = vrot.slane %v279_v49, %v283_v50  ;;  %vm1846_vm13 = vcmask 779776   ;;  %vm1852_vm14 = vcmask 1042176  }
  0x6d   :  { %316 = vmatpush1.bf16.msra.mxu0 %v2564_v2  ;;  %v123_v9 = vld [vmem:[%s122_s2] sm:$0x1]  ;;  %s125_s29 = scalar_lea.vmem [#allocation7], %s2195_s13  ;;  %s128_s8 = scalar_lea.vmem [#allocation7], %s2196_s30 }
  0x6e   :  { %317 = vmatprep.subr.bf16.mxu0 %v2565_v5  ;;  %v2210_v10 = vld [vmem:[%s125_s29] ss:$0 sm:$0xff]  ;;  %s131_s0 = scalar_lea.vmem [#allocation7], %s2197_s5  ;;  %2349 = vmatmul.mubr.bf16.vlgmr.msra.gmra.mrb[0].mxu1 %v2910_v4  ;;  %s134_s22 = scalar_lea.vmem [#allocation7], %s3096_s20 }
  0x6f   :  { %v2211_v11 = vld [vmem:[%s128_s8] ss:$0 sm:$0xff]  ;;  %v254_v13 = vsel %vm253_vm0, %v123_v9, %v2210_v10  ;;  %2361 = vmatpush3.bf16.msra.mxu1 %v3084_v6  ;;  %2364 = vmatprep.mubr.msk.bf16.mxu1 %vm2911_vm3, %v2909_v3  ;;  %s146_s13 = scalar_lea.vmem [#allocation7], %s2202_s26  ;;  %s137_s30 = scalar_lea.vmem [#allocation7], %s3098_s25 }
  0x70   :  { %v2212_v12 = vld [vmem:[%s131_s0] ss:$0 sm:$0xff]  ;;  %v256_v14 = vsel %vm255_vm1, %v254_v13, %v2211_v11  ;;  %2362 = vmatprep.subr.bf16.mxu1 %v2909_v3  ;;  %s149_s23 = scalar_lea.vmem [#allocation7], %s2203_s21  ;;  %s152_s24 = scalar_lea.vmem [#allocation7], %s3106_s27 }
  0x71   :  { %318 = vmatpush1.bf16.msra.mxu0 %v2568_v7  ;;  %v2213_v15 = vld [vmem:[%s134_s22] ss:$0 sm:$0xff]  ;;  %v258_v16 = vsel %vm257_vm2, %v256_v14, %v2212_v12  ;;  %s2206_s5 = sld [smem:[#allocation3 + $0x6]]  ;;  %s140_s2 = scalar_lea.vmem [#allocation7], %s3100_s1 }
  0x72   :  { %2352 = vmatprep.subr.bf16.mxu0 %v2909_v3  ;;  %v147_v17 = vld [vmem:[%s146_s13] sm:$0x1]  ;;  %s2207_s20 = sld [smem:[#allocation3 + $0x86]]  ;;  %v260_v21 = vsel %vm259_vm4, %v258_v16, %v2213_v15  ;;  %s2208_s26 = sld [smem:[#allocation3 + $0x7]] }
  0x73   :  { %v2217_v18 = vld [vmem:[%s149_s23] ss:$0 sm:$0xff]  ;;  %2363 = vmatpush3.bf16.msra.mxu1 %v3093_v8  ;;  %s2209_s29 = sld [smem:[#allocation3 + $0x87]]  ;;  %s155_s21 = scalar_lea.vmem [#allocation7], %s3108_s28 }
  0x74   :  { %v2218_v19 = vld [vmem:[%s152_s24] ss:$0 sm:$0xff]  ;;  %v267_v22 = vsel %vm253_vm0, %v147_v17, %v2217_v18  ;;  %2376 = vmatprep.subr.bf16.mxu1 %v2909_v3  ;;  %s143_s25 = scalar_lea.vmem [#allocation7], %s3103_s19  ;;  %s2912_s4 = smov 32  }
  0x75   :  { %v2214_v20 = vld [vmem:[%s137_s30] ss:$0 sm:$0xff]  ;;  %v268_v25 = vsel %vm255_vm1, %v267_v22, %v2218_v19  ;;  %s2915_s28 = smov [#allocation14]  }
  0x76   :  { %v2215_v23 = vld [vmem:[%s140_s2] ss:$0 sm:$0xff]  ;;  %v262_v26 = vsel %vm261_vm5, %v260_v21, %v2214_v20  ;;  %s2141_s22 = sshll.u32 %s2915_s28, 4  ;;  %s2142_s22 = int_to_ptr.vmem [resolvable:$true] %s2141_s22 }
  0x77   :  { %v2219_v24 = vld [vmem:[%s155_s21] ss:$0 sm:$0xff]  ;;  %v264_v29 = vsel %vm263_vm6, %v262_v26, %v2215_v23  ;;  %s158_s27 = scalar_lea.vmem [#allocation7], %s2206_s5  ;;  %p2827_p10 = scmp.lt.s32.totalorder %s2142_s22, %s2142_s22 }
  0x78   :  { %v2216_v27 = vld [vmem:[%s143_s25] ss:$0 sm:$0xff]  ;;  %v269_v28 = vsel %vm257_vm2, %v268_v25, %v2219_v24  ;;  %s161_s1 = scalar_lea.vmem [#allocation7], %s2207_s20  ;;  %s164_s8 = scalar_lea.vmem [#allocation7], %s2208_s26 }
  0x79   :  { %v2220_v30 = vld [vmem:[%s158_s27] ss:$0 sm:$0xff]  ;;  %s167_s0 = scalar_lea.vmem [#allocation7], %s2209_s29  ;;  %v3137_v35 = vsel %vm265_vm7, %v264_v29, %v2216_v27 }
  0x7a   :  { %v2221_v31 = vld [vmem:[%s161_s1] ss:$0 sm:$0xff]  ;;  %v270_v34 = vsel %vm259_vm4, %v269_v28, %v2220_v30 }
  0x7b   :  { %v2222_v32 = vld [vmem:[%s164_s8] ss:$0 sm:$0xff]  ;;  %v271_v36 = vsel %vm261_vm5, %v270_v34, %v2221_v31 }
  0x7c   :  { %v2223_v33 = vld [vmem:[%s167_s0] ss:$0 sm:$0xff]  ;;  %v272_v37 = vsel %vm263_vm6, %v271_v36, %v2222_v32 }
  0x7d   :  { %v3142_v38 = vsel %vm265_vm7, %v272_v37, %v2223_v33 }
  0x7e   :  { %v274_v40 = vpack.c.bf16 %v3142_v38, %v3137_v35 }
  0x80   :  { %2228 = vmatmul.mubr.msk.bf16.vlgmr.msra.gmra.mrb[0].mxu0 %vm311_vm8, %v274_v40 }
  0x81   :  { %2353 = vmatpush3.bf16.msra.mxu0 %v3147_v39  ;;  %2356 = vmatprep.mubr.msk.bf16.mxu0 %vm2911_vm3, %v2909_v3 }
  0x82   :  { %2354 = vmatprep.subr.bf16.mxu0 %v2909_v3 }
  0x85   :  { %2355 = vmatpush3.bf16.msra.mxu0 %v3156_v41 }
  0x86   :  { %2368 = vmatprep.subr.bf16.mxu0 %v2909_v3 }
  0x88   :  { %2357 = vmatmul.mubr.bf16.vlgmr.msra.gmra.mrb[4].mxu0 %v2910_v4 }
  0x89   :  { %2369 = vmatpush3.bf16.msra.mxu0 %v3147_v39  ;;  %2372 = vmatprep.mubr.msk.bf16.mxu0 %vm2911_vm3, %v2909_v3 }
  0x8a   :  { %2370 = vmatprep.subr.bf16.mxu0 %v2909_v3 }
  0x8d   :  { %2371 = vmatpush3.bf16.msra.mxu0 %v3156_v41 }
  0x8e   :  { %2384 = vmatprep.subr.bf16.mxu0 %v2909_v3 }
 0x141   :  { %v415_v42 = vpop.f32.mrb[0].mxu1 }
 0x142   :  { %v2350_v43 = vpop.f32.mrb[1].mxu1 }
 0x143   :  { %v418_v44 = vpop.f32.mrb[2].mxu1 }
 0x144   :  { %v2351_v45 = vpop.f32.mrb[3].mxu1 }
 0x153   :  { %v349_v52 = vpop.f32.mrb[0].mxu0 }
 0x154   :  { %v351_v54 = vpop.f32.mrb[1].mxu0  ;;  %v3178_v60 = vadd.f32 %v349_v52, %v284_v53 }
 0x155   :  { %v3174_v55 = vadd.f32 %v351_v54, %v288_v51  ;;  %v353_v56 = vpop.f32.mrb[2].mxu0 }
 0x156   :  { %v3176_v57 = vadd.f32 %v353_v56, %v284_v53  ;;  %v355_v58 = vpop.f32.mrb[3].mxu0  ;;  %v421_v4 = vadd.f32 %v415_v42, %v3178_v60 }
 0x157   :  { %v3180_v61 = vadd.f32 %v355_v58, %v288_v51 }
 0x158   :  { %v2231_v10 = vmul.f32 -1.442695, %v421_v4 }
 0x15b   :  { %v492_v59 = vpop.f32.mrb[4].mxu0 }
 0x15c   :  { %v499_v62 = vrot.slane %v492_v59, 2  ;;  %v2358_v63 = vpop.f32.mrb[5].mxu0 }
 0x15d   :  { %v495_v0 = vpop.f32.mrb[6].mxu0 }
 0x15e   :  { %v501_v1 = vadd.f32 %v499_v62, %v3180_v61  ;;  %v2359_v2 = vpop.f32.mrb[7].mxu0 }
 0x160   :  { %2582 = vtanh.f32 %v501_v1  ;;  %v2234_v9 = vmul.f32 -1.442695, %v501_v1 }
 0x161   :  { %2584 = vtanh.f32 %v421_v4 }
 0x162   :  { %2586 = vpow2.f32 %v2234_v9 }
 0x163   :  { %2588 = vpow2.f32 %v2231_v10 }
 0x16a   :  { %v2583_v5 = vpop.eup %2582 }
 0x16b   :  { %511 = vrot.lane.b32.xlu0 %v2583_v5, %s2907_s7  ;;  %v2585_v7 = vpop.eup %2584 }
 0x16c   :  { %v2587_v11 = vpop.eup %2586 }
 0x16d   :  { %v505_v12 = vadd.f32 1.0, %v2587_v11  ;;  %v2589_v13 = vpop.eup %2588 }
 0x16e   :  { %v425_v14 = vadd.f32 1.0, %v2589_v13 }
 0x16f   :  { %431 = vrot.lane.b32.xlu0 %v2585_v7, %s2907_s7  ;;  %2590 = vrcp.f32 %v505_v12 }
 0x170   :  { %2592 = vrcp.f32 %v425_v14 }
 0x179   :  { %v2591_v15 = vpop.eup %2590 }
 0x17a   :  { %v2593_v18 = vpop.eup %2592  ;;  %v509_v21 = vmul.f32 0.0, %v2591_v15 }
 0x17b   :  { %v429_v24 = vmul.f32 0.0, %v2593_v18 }
 0x1dd   :  { %v512_v16 = vpop.permute.xlu0 %511 }
 0x1de   :  { %v514_v17 = vmul.f32 %v2591_v15, %v512_v16 }
 0x1e0   :  { %516 = vrot.lane.b32.xlu1 %v514_v17, %s2912_s4 }
 0x1e1   :  { %v432_v19 = vpop.permute.xlu0 %431 }
 0x1e2   :  { %v434_v20 = vmul.f32 %v2593_v18, %v432_v19 }
 0x1e4   :  { %436 = vrot.lane.b32.xlu1 %v434_v20, %s2912_s4 }
 0x252   :  { %v517_v22 = vpop.permute.xlu1 %516 }
 0x253   :  { %v3188_v23 = vadd.f32 %v517_v22, %v509_v21 }
 0x255   :  { %2594 = vtanh.f32 %v3188_v23  ;;  %v664_v12 = vrot.slane %v3188_v23, 2 }
 0x256   :  { %v437_v25 = vpop.permute.xlu1 %436 }
 0x257   :  { %v3191_v26 = vadd.f32 %v437_v25, %v429_v24 }
 0x259   :  { %2596 = vtanh.f32 %v3191_v26  ;;  %v585_v14 = vrot.slane %v3191_v26, 6 }
 0x25f   :  { %v2595_v27 = vpop.eup %2594 }
 0x260   :  { %522 = vrot.lane.b32.xlu0 %v2595_v27, %s2907_s7 }
 0x263   :  { %v2597_v28 = vpop.eup %2596 }
 0x264   :  { %442 = vrot.lane.b32.xlu1 %v2597_v28, %s2907_s7 }
 0x2d2   :  { %v523_v29 = vpop.permute.xlu0 %522 }
 0x2d3   :  { %v3196_v30 = vmul.f32 %v2591_v15, %v523_v29 }
 0x2d5   :  { %v604_v31 = vpack.c.bf16 %v3196_v30, %v3196_v30 }
 0x2d6   :  { %v443_v32 = vpop.permute.xlu1 %442 }
 0x2d7   :  { %v606_v33 = vrot.slane %v604_v31, 3  ;;  %v3200_v34 = vmul.f32 %v2593_v18, %v443_v32 }
 0x2d9   :  { %v526_v36 = vpack.c.bf16 %v3200_v34, %v3200_v34  ;;  %607 = vrot.lane.b32.xlu1 %v606_v33, %s2912_s4 }
 0x2db   :  { %528 = vrot.lane.b32.xlu0 %v526_v36, %s2912_s4 }
 0x34b   :  { %v608_v37 = vpop.permute.xlu1 %607 }
 0x34c   :  { %2373 = vmatmul.mubr.msk.bf16.vlgmr.msra.gmra.mrb[8].mxu0 %vm311_vm8, %v608_v37 }
 0x34d   :  { %v529_v40 = vpop.permute.xlu0 %528  ;;  %2385 = vmatpush3.bf16.msra.mxu0 %v3147_v39  ;;  %2388 = vmatprep.mubr.msk.bf16.mxu0 %vm2911_vm3, %v2909_v3 }
 0x34e   :  { %2365 = vmatmul.mubr.msk.bf16.vlgmr.msra.gmra.mrb[4].mxu1 %vm311_vm8, %v529_v40  ;;  %2386 = vmatprep.subr.bf16.mxu0 %v2909_v3 }
 0x34f   :  { %2377 = vmatpush3.bf16.msra.mxu1 %v3084_v6  ;;  %2380 = vmatprep.mubr.msk.bf16.mxu1 %vm2911_vm3, %v2909_v3 }
 0x350   :  { %2378 = vmatprep.subr.bf16.mxu1 %v2909_v3 }
 0x351   :  { %2387 = vmatpush3.bf16.msra.mxu0 %v3156_v41 }
 0x352   :  { %2400 = vmatprep.subr.bf16.mxu0 %v2909_v3 }
 0x353   :  { %2379 = vmatpush3.bf16.msra.mxu1 %v3093_v8 }
 0x354   :  { %2392 = vmatprep.subr.bf16.mxu1 %v2909_v3 }
 0x41f   :  { %v646_v42 = vpop.f32.mrb[8].mxu0 }
 0x420   :  { %v653_v43 = vrot.slane %v646_v42, 4  ;;  %v2374_v44 = vpop.f32.mrb[9].mxu0 }
 0x421   :  { %v567_v45 = vpop.f32.mrb[4].mxu1  ;;  %v649_v46 = vpop.f32.mrb[10].mxu0 }
 0x422   :  { %v655_v48 = vadd.f32 %v653_v43, %v3180_v61  ;;  %v574_v49 = vrot.slane %v567_v45, 6  ;;  %v2366_v50 = vpop.f32.mrb[5].mxu1  ;;  %v2375_v51 = vpop.f32.mrb[11].mxu0 }
 0x423   :  { %v570_v52 = vpop.f32.mrb[6].mxu1 }
 0x424   :  { %2598 = vtanh.f32 %v655_v48  ;;  %v576_v53 = vadd.f32 %v574_v49, %v3178_v60  ;;  %v2367_v54 = vpop.f32.mrb[7].mxu1  ;;  %v2238_v59 = vmul.f32 -1.442695, %v655_v48 }
 0x426   :  { %2600 = vtanh.f32 %v576_v53  ;;  %v2236_v62 = vmul.f32 -1.442695, %v576_v53 }
 0x427   :  { %2602 = vpow2.f32 %v2238_v59 }
 0x428   :  { %2604 = vpow2.f32 %v2236_v62 }
 0x42e   :  { %v2599_v56 = vpop.eup %2598 }
 0x42f   :  { %668 = vrot.lane.b32.xlu1 %v2599_v56, %s2907_s7 }
 0x430   :  { %v2601_v58 = vpop.eup %2600 }
 0x431   :  { %589 = vrot.lane.b32.xlu0 %v2601_v58, %s2907_s7  ;;  %v2603_v63 = vpop.eup %2602 }
 0x432   :  { %v2605_v0 = vpop.eup %2604  ;;  %v659_v1 = vadd.f32 1.0, %v2603_v63 }
 0x433   :  { %v580_v2 = vadd.f32 1.0, %v2605_v0 }
 0x434   :  { %2606 = vrcp.f32 %v659_v1 }
 0x435   :  { %2608 = vrcp.f32 %v580_v2 }
 0x43e   :  { %v2607_v4 = vpop.eup %2606 }
 0x43f   :  { %v2609_v9 = vpop.eup %2608  ;;  %v666_v13 = vmul.f32 %v2607_v4, %v664_v12 }
 0x440   :  { %v587_v17 = vmul.f32 %v2609_v9, %v585_v14 }
 0x4a1   :  { %v669_v5 = vpop.permute.xlu1 %668 }
 0x4a2   :  { %v671_v7 = vmul.f32 %v2607_v4, %v669_v5 }
 0x4a3   :  { %v590_v10 = vpop.permute.xlu0 %589 }
 0x4a4   :  { %673 = vrot.lane.b32.xlu1 %v671_v7, %s2912_s4  ;;  %v592_v11 = vmul.f32 %v2609_v9, %v590_v10 }
 0x4a6   :  { %594 = vrot.lane.b32.xlu0 %v592_v11, %s2912_s4 }
 0x516   :  { %v674_v15 = vpop.permute.xlu1 %673 }
 0x517   :  { %v3228_v16 = vadd.f32 %v674_v15, %v666_v13 }
 0x518   :  { %v595_v18 = vpop.permute.xlu0 %594 }
 0x519   :  { %2610 = vtanh.f32 %v3228_v16  ;;  %v3231_v19 = vadd.f32 %v595_v18, %v587_v17  ;;  %v822_v7 = vrot.slane %v3228_v16, 2 }
 0x51b   :  { %2612 = vtanh.f32 %v3231_v19  ;;  %v743_v10 = vrot.slane %v3231_v19, 6 }
 0x523   :  { %v2611_v20 = vpop.eup %2610 }
 0x524   :  { %679 = vrot.lane.b32.xlu1 %v2611_v20, %s2907_s7 }
 0x525   :  { %v2613_v21 = vpop.eup %2612 }
 0x526   :  { %600 = vrot.lane.b32.xlu0 %v2613_v21, %s2907_s7 }
 0x596   :  { %v680_v22 = vpop.permute.xlu1 %679 }
 0x597   :  { %v3236_v23 = vmul.f32 %v2607_v4, %v680_v22 }
 0x598   :  { %v601_v25 = vpop.permute.xlu0 %600 }
 0x599   :  { %v762_v24 = vpack.c.bf16 %v3236_v23, %v3236_v23  ;;  %v3240_v26 = vmul.f32 %v2609_v9, %v601_v25 }
 0x59b   :  { %v764_v27 = vrot.slane %v762_v24, 2  ;;  %v683_v28 = vpack.c.bf16 %v3240_v26, %v3240_v26 }
 0x59d   :  { %765 = vrot.lane.b32.xlu1 %v764_v27, %s2912_s4  ;;  %v685_v29 = vrot.slane %v683_v28, 1 }
 0x59f   :  { %686 = vrot.lane.b32.xlu0 %v685_v29, %s2912_s4 }
 0x60f   :  { %v766_v31 = vpop.permute.xlu1 %765 }
 0x610   :  { %2389 = vmatmul.mubr.msk.bf16.vlgmr.msra.gmra.mrb[12].mxu0 %vm311_vm8, %v766_v31 }
 0x611   :  { %2401 = vmatpush3.bf16.msra.mxu0 %v3147_v39  ;;  %2404 = vmatprep.mubr.msk.bf16.mxu0 %vm2911_vm3, %v2909_v3  ;;  %v687_v32 = vpop.permute.xlu0 %686 }
 0x612   :  { %2402 = vmatprep.subr.bf16.mxu0 %v2909_v3  ;;  %2381 = vmatmul.mubr.msk.bf16.vlgmr.msra.gmra.mrb[8].mxu1 %vm311_vm8, %v687_v32 }
 0x613   :  { %2393 = vmatpush3.bf16.msra.mxu1 %v3084_v6  ;;  %2396 = vmatprep.mubr.msk.bf16.mxu1 %vm2911_vm3, %v2909_v3 }
 0x614   :  { %2394 = vmatprep.subr.bf16.mxu1 %v2909_v3 }
 0x615   :  { %2403 = vmatpush3.bf16.msra.mxu0 %v3156_v41 }
 0x616   :  { %2416 = vmatprep.subr.bf16.mxu0 %v2909_v3 }
 0x617   :  { %2395 = vmatpush3.bf16.msra.mxu1 %v3093_v8 }
 0x618   :  { %2408 = vmatprep.subr.bf16.mxu1 %v2909_v3 }
 0x6e3   :  { %v804_v33 = vpop.f32.mrb[12].mxu0 }
 0x6e4   :  { %v811_v36 = vrot.slane %v804_v33, 6  ;;  %v2390_v37 = vpop.f32.mrb[13].mxu0 }
 0x6e5   :  { %v807_v40 = vpop.f32.mrb[14].mxu0  ;;  %v725_v43 = vpop.f32.mrb[8].mxu1 }
 0x6e6   :  { %v813_v42 = vadd.f32 %v811_v36, %v3180_v61  ;;  %v2391_v44 = vpop.f32.mrb[15].mxu0  ;;  %v732_v45 = vrot.slane %v725_v43, 4  ;;  %v2382_v46 = vpop.f32.mrb[9].mxu1 }
 0x6e7   :  { %v728_v48 = vpop.f32.mrb[10].mxu1 }
 0x6e8   :  { %2614 = vtanh.f32 %v813_v42  ;;  %v734_v49 = vadd.f32 %v732_v45, %v3178_v60  ;;  %v2383_v50 = vpop.f32.mrb[11].mxu1  ;;  %v2242_v53 = vmul.f32 -1.442695, %v813_v42 }
 0x6ea   :  { %2616 = vtanh.f32 %v734_v49  ;;  %v2240_v54 = vmul.f32 -1.442695, %v734_v49 }
 0x6eb   :  { %2618 = vpow2.f32 %v2242_v53 }
 0x6ec   :  { %2620 = vpow2.f32 %v2240_v54 }
 0x6f2   :  { %v2615_v51 = vpop.eup %2614 }
 0x6f3   :  { %826 = vrot.lane.b32.xlu1 %v2615_v51, %s2907_s7 }
 0x6f4   :  { %v2617_v52 = vpop.eup %2616 }
 0x6f5   :  { %747 = vrot.lane.b32.xlu0 %v2617_v52, %s2907_s7  ;;  %v2619_v56 = vpop.eup %2618 }
 0x6f6   :  { %v2621_v58 = vpop.eup %2620  ;;  %v817_v59 = vadd.f32 1.0, %v2619_v56 }
 0x6f7   :  { %v738_v62 = vadd.f32 1.0, %v2621_v58 }
 0x6f8   :  { %2622 = vrcp.f32 %v817_v59 }
 0x6f9   :  { %2624 = vrcp.f32 %v738_v62 }
 0x702   :  { %v2623_v63 = vpop.eup %2622 }
 0x703   :  { %v2625_v2 = vpop.eup %2624  ;;  %v824_v9 = vmul.f32 %v2623_v63, %v822_v7 }
 0x704   :  { %v745_v13 = vmul.f32 %v2625_v2, %v743_v10 }
 0x765   :  { %v827_v0 = vpop.permute.xlu1 %826 }
 0x766   :  { %v829_v1 = vmul.f32 %v2623_v63, %v827_v0 }
 0x767   :  { %v748_v4 = vpop.permute.xlu0 %747 }
 0x768   :  { %831 = vrot.lane.b32.xlu1 %v829_v1, %s2912_s4  ;;  %v750_v5 = vmul.f32 %v2625_v2, %v748_v4 }
 0x76a   :  { %752 = vrot.lane.b32.xlu0 %v750_v5, %s2912_s4 }
 0x7da   :  { %v832_v11 = vpop.permute.xlu1 %831 }
 0x7db   :  { %v3268_v12 = vadd.f32 %v832_v11, %v824_v9 }
 0x7dc   :  { %v753_v14 = vpop.permute.xlu0 %752 }
 0x7dd   :  { %2626 = vtanh.f32 %v3268_v12  ;;  %v3271_v15 = vadd.f32 %v753_v14, %v745_v13  ;;  %v977_v0 = vrot.slane %v3268_v12, 2 }
 0x7df   :  { %2628 = vtanh.f32 %v3271_v15  ;;  %v901_v5 = vrot.slane %v3271_v15, 6 }
 0x7e7   :  { %v2627_v17 = vpop.eup %2626 }
 0x7e8   :  { %837 = vrot.lane.b32.xlu1 %v2627_v17, %s2907_s7 }
 0x7e9   :  { %v2629_v18 = vpop.eup %2628 }
 0x7ea   :  { %758 = vrot.lane.b32.xlu0 %v2629_v18, %s2907_s7 }
 0x85a   :  { %v838_v16 = vpop.permute.xlu1 %837 }
 0x85b   :  { %v3276_v20 = vmul.f32 %v2623_v63, %v838_v16 }
 0x85c   :  { %v759_v21 = vpop.permute.xlu0 %758 }
 0x85d   :  { %v920_v19 = vpack.c.bf16 %v3276_v20, %v3276_v20  ;;  %v3280_v22 = vmul.f32 %v2625_v2, %v759_v21 }
 0x85f   :  { %v922_v24 = vrot.slane %v920_v19, 1  ;;  %v841_v25 = vpack.c.bf16 %v3280_v22, %v3280_v22 }
 0x861   :  { %923 = vrot.lane.b32.xlu1 %v922_v24, %s2912_s4  ;;  %v843_v27 = vrot.slane %v841_v25, 2 }
 0x863   :  { %844 = vrot.lane.b32.xlu0 %v843_v27, %s2912_s4 }
 0x8d3   :  { %v924_v28 = vpop.permute.xlu1 %923 }
 0x8d4   :  { %2405 = vmatmul.mubr.msk.bf16.vlgmr.msra.gmra.mrb[16].mxu0 %vm311_vm8, %v924_v28 }
 0x8d5   :  { %2417 = vmatpush3.bf16.msra.mxu0 %v3147_v39  ;;  %2420 = vmatprep.mubr.msk.bf16.mxu0 %vm2911_vm3, %v2909_v3  ;;  %v845_v29 = vpop.permute.xlu0 %844 }
 0x8d6   :  { %2418 = vmatprep.subr.bf16.mxu0 %v2909_v3  ;;  %2397 = vmatmul.mubr.msk.bf16.vlgmr.msra.gmra.mrb[12].mxu1 %vm311_vm8, %v845_v29 }
 0x8d7   :  { %2409 = vmatpush3.bf16.msra.mxu1 %v3084_v6  ;;  %2412 = vmatprep.mubr.msk.bf16.mxu1 %vm2911_vm3, %v2909_v3 }
 0x8d8   :  { %2410 = vmatprep.subr.bf16.mxu1 %v2909_v3 }
 0x8d9   :  { %2419 = vmatpush3.bf16.msra.mxu0 %v3156_v41 }
 0x8da   :  { %2432 = vmatprep.subr.bf16.mxu0 %v2909_v3 }
 0x8db   :  { %2411 = vmatpush3.bf16.msra.mxu1 %v3093_v8 }
 0x8dc   :  { %2424 = vmatprep.subr.bf16.mxu1 %v2909_v3 }
 0x9a7   :  { %v962_v31 = vpop.f32.mrb[16].mxu0 }
 0x9a8   :  { %v968_v32 = vadd.f32 %v962_v31, %v3180_v61  ;;  %v2406_v33 = vpop.f32.mrb[17].mxu0 }
 0x9a9   :  { %v965_v36 = vpop.f32.mrb[18].mxu0  ;;  %v883_v37 = vpop.f32.mrb[12].mxu1 }
 0x9aa   :  { %2630 = vtanh.f32 %v968_v32  ;;  %v2407_v40 = vpop.f32.mrb[19].mxu0  ;;  %v890_v42 = vrot.slane %v883_v37, 2  ;;  %v2398_v43 = vpop.f32.mrb[13].mxu1  ;;  %v2246_v50 = vmul.f32 -1.442695, %v968_v32 }
 0x9ab   :  { %v886_v44 = vpop.f32.mrb[14].mxu1 }
 0x9ac   :  { %v892_v45 = vadd.f32 %v890_v42, %v3178_v60  ;;  %v2399_v46 = vpop.f32.mrb[15].mxu1 }
 0x9ae   :  { %2632 = vtanh.f32 %v892_v45  ;;  %v2244_v61 = vmul.f32 -1.442695, %v892_v45 }
 0x9af   :  { %2634 = vpow2.f32 %v2246_v50 }
 0x9b0   :  { %2636 = vpow2.f32 %v2244_v61 }
 0x9b4   :  { %v2631_v48 = vpop.eup %2630 }
 0x9b5   :  { %981 = vrot.lane.b32.xlu0 %v2631_v48, %s2907_s7 }
 0x9b8   :  { %v2633_v49 = vpop.eup %2632 }
 0x9b9   :  { %905 = vrot.lane.b32.xlu1 %v2633_v49, %s2907_s7  ;;  %v2635_v51 = vpop.eup %2634 }
 0x9ba   :  { %v972_v52 = vadd.f32 1.0, %v2635_v51  ;;  %v2637_v53 = vpop.eup %2636 }
 0x9bb   :  { %v896_v54 = vadd.f32 1.0, %v2637_v53 }
 0x9bc   :  { %2638 = vrcp.f32 %v972_v52 }
 0x9bd   :  { %2640 = vrcp.f32 %v896_v54 }
 0x9c6   :  { %v2639_v56 = vpop.eup %2638 }
 0x9c7   :  { %v2641_v59 = vpop.eup %2640  ;;  %v979_v1 = vmul.f32 %v2639_v56, %v977_v0 }
 0x9c8   :  { %v903_v7 = vmul.f32 %v2641_v59, %v901_v5 }
 0xa27   :  { %v982_v60 = vpop.permute.xlu0 %981 }
 0xa28   :  { %v984_v58 = vmul.f32 %v2639_v56, %v982_v60 }
 0xa2a   :  { %986 = vrot.lane.b32.xlu0 %v984_v58, %s2912_s4 }
 0xa2b   :  { %v906_v62 = vpop.permute.xlu1 %905 }
 0xa2c   :  { %v908_v63 = vmul.f32 %v2641_v59, %v906_v62 }
 0xa2e   :  { %910 = vrot.lane.b32.xlu1 %v908_v63, %s2912_s4 }
 0xa9c   :  { %v987_v2 = vpop.permute.xlu0 %986 }
 0xa9d   :  { %v3307_v4 = vadd.f32 %v987_v2, %v979_v1 }
 0xa9f   :  { %2642 = vtanh.f32 %v3307_v4  ;;  %v1131_v58 = vrot.slane %v3307_v4, 2 }
 0xaa0   :  { %v911_v9 = vpop.permute.xlu1 %910 }
 0xaa1   :  { %v3311_v10 = vadd.f32 %v911_v9, %v903_v7 }
 0xaa3   :  { %2644 = vtanh.f32 %v3311_v10  ;;  %v1053_v0 = vrot.slane %v3311_v10, 6 }
 0xaa9   :  { %v2643_v11 = vpop.eup %2642 }
 0xaaa   :  { %992 = vrot.lane.b32.xlu0 %v2643_v11, %s2907_s7 }
 0xaad   :  { %v2645_v13 = vpop.eup %2644 }
 0xaae   :  { %916 = vrot.lane.b32.xlu1 %v2645_v13, %s2907_s7 }
 0xb1c   :  { %v993_v12 = vpop.permute.xlu0 %992 }
 0xb1d   :  { %v3316_v14 = vmul.f32 %v2639_v56, %v993_v12 }
 0xb1f   :  { %v1072_v15 = vpack.c.bf16 %v3316_v14, %v3316_v14 }
 0xb20   :  { %v917_v17 = vpop.permute.xlu1 %916 }
 0xb21   :  { %1074 = vrot.lane.b32.xlu0 %v1072_v15, %s2912_s4  ;;  %v3321_v18 = vmul.f32 %v2641_v59, %v917_v17 }
 0xb23   :  { %v996_v16 = vpack.c.bf16 %v3321_v18, %v3321_v18 }
 0xb25   :  { %v998_v19 = vrot.slane %v996_v16, 3 }
 0xb27   :  { %999 = vrot.lane.b32.xlu1 %v998_v19, %s2912_s4 }
 0xb93   :  { %v1075_v21 = vpop.permute.xlu0 %1074 }
 0xb94   :  { %2421 = vmatmul.mubr.msk.bf16.vlgmr.msra.gmra.mrb[20].mxu0 %vm311_vm8, %v1075_v21 }
 0xb95   :  { %2433 = vmatpush3.bf16.msra.mxu0 %v3147_v39  ;;  %2436 = vmatprep.mubr.msk.bf16.mxu0 %vm2911_vm3, %v2909_v3 }
 0xb96   :  { %2434 = vmatprep.subr.bf16.mxu0 %v2909_v3 }
 0xb99   :  { %2435 = vmatpush3.bf16.msra.mxu0 %v3156_v41  ;;  %v1000_v24 = vpop.permute.xlu1 %999 }
 0xb9a   :  { %2448 = vmatprep.subr.bf16.mxu0 %v2909_v3  ;;  %2413 = vmatmul.mubr.msk.bf16.vlgmr.msra.gmra.mrb[16].mxu1 %vm311_vm8, %v1000_v24 }
 0xb9b   :  { %2425 = vmatpush3.bf16.msra.mxu1 %v3084_v6  ;;  %2428 = vmatprep.mubr.msk.bf16.mxu1 %vm2911_vm3, %v2909_v3 }
 0xb9c   :  { %2426 = vmatprep.subr.bf16.mxu1 %v2909_v3 }
 0xb9f   :  { %2427 = vmatpush3.bf16.msra.mxu1 %v3093_v8 }
 0xba0   :  { %2440 = vmatprep.subr.bf16.mxu1 %v2909_v3 }
 0xc67   :  { %v1113_v25 = vpop.f32.mrb[20].mxu0 }
 0xc68   :  { %v1120_v27 = vrot.slane %v1113_v25, 2  ;;  %v2422_v28 = vpop.f32.mrb[21].mxu0 }
 0xc69   :  { %v1116_v29 = vpop.f32.mrb[22].mxu0 }
 0xc6a   :  { %v1122_v31 = vadd.f32 %v1120_v27, %v3174_v55  ;;  %v2423_v32 = vpop.f32.mrb[23].mxu0 }
 0xc6c   :  { %2646 = vtanh.f32 %v1122_v31  ;;  %v2250_v45 = vmul.f32 -1.442695, %v1122_v31 }
 0xc6d   :  { %v1038_v33 = vpop.f32.mrb[16].mxu1 }
 0xc6e   :  { %v1044_v36 = vadd.f32 %v1038_v33, %v3176_v57  ;;  %v2414_v37 = vpop.f32.mrb[17].mxu1 }
 0xc6f   :  { %v1041_v40 = vpop.f32.mrb[18].mxu1 }
 0xc70   :  { %2648 = vtanh.f32 %v1044_v36  ;;  %v2415_v42 = vpop.f32.mrb[19].mxu1  ;;  %v2248_v46 = vmul.f32 -1.442695, %v1044_v36 }
 0xc71   :  { %2650 = vpow2.f32 %v2250_v45 }
 0xc72   :  { %2652 = vpow2.f32 %v2248_v46 }
 0xc76   :  { %v2647_v43 = vpop.eup %2646 }
 0xc77   :  { %1135 = vrot.lane.b32.xlu0 %v2647_v43, %s2907_s7 }
 0xc7a   :  { %v2649_v44 = vpop.eup %2648 }
 0xc7b   :  { %1057 = vrot.lane.b32.xlu1 %v2649_v44, %s2907_s7  ;;  %v2651_v48 = vpop.eup %2650 }
 0xc7c   :  { %v1126_v49 = vadd.f32 1.0, %v2651_v48  ;;  %v2653_v50 = vpop.eup %2652 }
 0xc7d   :  { %v1048_v61 = vadd.f32 1.0, %v2653_v50 }
 0xc7e   :  { %2654 = vrcp.f32 %v1126_v49 }
 0xc7f   :  { %2656 = vrcp.f32 %v1048_v61 }
 0xc88   :  { %v2655_v51 = vpop.eup %2654 }
 0xc89   :  { %v2657_v54 = vpop.eup %2656  ;;  %v1133_v59 = vmul.f32 %v2655_v51, %v1131_v58 }
 0xc8a   :  { %v1055_v1 = vmul.f32 %v2657_v54, %v1053_v0 }
 0xce9   :  { %v1136_v52 = vpop.permute.xlu0 %1135 }
 0xcea   :  { %v1138_v53 = vmul.f32 %v2655_v51, %v1136_v52 }
 0xcec   :  { %1140 = vrot.lane.b32.xlu0 %v1138_v53, %s2912_s4 }
 0xced   :  { %v1058_v56 = vpop.permute.xlu1 %1057 }
 0xcee   :  { %v1060_v60 = vmul.f32 %v2657_v54, %v1058_v56 }
 0xcf0   :  { %1062 = vrot.lane.b32.xlu1 %v1060_v60, %s2912_s4 }
 0xd5e   :  { %v1141_v62 = vpop.permute.xlu0 %1140 }
 0xd5f   :  { %v3347_v63 = vadd.f32 %v1141_v62, %v1133_v59 }
 0xd61   :  { %2658 = vtanh.f32 %v3347_v63 }
 0xd62   :  { %v1063_v2 = vpop.permute.xlu1 %1062 }
 0xd63   :  { %v3351_v5 = vadd.f32 %v1063_v2, %v1055_v1 }
 0xd65   :  { %2660 = vtanh.f32 %v3351_v5  ;;  %v1209_v60 = vrot.slane %v3351_v5, 6 }
 0xd6b   :  { %v2659_v7 = vpop.eup %2658 }
 0xd6c   :  { %1146 = vrot.lane.b32.xlu0 %v2659_v7, %s2907_s7 }
 0xd6f   :  { %v2661_v9 = vpop.eup %2660 }
 0xd70   :  { %1068 = vrot.lane.b32.xlu1 %v2661_v9, %s2907_s7 }
 0xdde   :  { %v1147_v4 = vpop.permute.xlu0 %1146 }
 0xddf   :  { %v3356_v11 = vmul.f32 %v2655_v51, %v1147_v4 }
 0xde1   :  { %v1228_v10 = vpack.c.bf16 %v3356_v11, %v3356_v11 }
 0xde2   :  { %v1069_v12 = vpop.permute.xlu1 %1068 }
 0xde3   :  { %v1230_v13 = vrot.slane %v1228_v10, 3  ;;  %v3360_v15 = vmul.f32 %v2657_v54, %v1069_v12  ;;  %v1288_v54 = vrot.slane %v3347_v63, 2 }
 0xde5   :  { %1231 = vrot.lane.b32.xlu1 %v1230_v13, %s2912_s4  ;;  %v1150_v17 = vpack.c.bf16 %v3360_v15, %v3360_v15 }
 0xde7   :  { %1152 = vrot.lane.b32.xlu0 %v1150_v17, %s2912_s4 }
 0xe57   :  { %v1232_v16 = vpop.permute.xlu1 %1231 }
 0xe58   :  { %2437 = vmatmul.mubr.msk.bf16.vlgmr.msra.gmra.mrb[24].mxu0 %vm311_vm8, %v1232_v16 }
 0xe59   :  { %2449 = vmatpush3.bf16.msra.mxu0 %v3147_v39  ;;  %2452 = vmatprep.mubr.msk.bf16.mxu0 %vm2911_vm3, %v2909_v3  ;;  %v1153_v19 = vpop.permute.xlu0 %1152 }
 0xe5a   :  { %2450 = vmatprep.subr.bf16.mxu0 %v2909_v3  ;;  %2429 = vmatmul.mubr.msk.bf16.vlgmr.msra.gmra.mrb[20].mxu1 %vm311_vm8, %v1153_v19 }
 0xe5b   :  { %2441 = vmatpush3.bf16.msra.mxu1 %v3084_v6  ;;  %2444 = vmatprep.mubr.msk.bf16.mxu1 %vm2911_vm3, %v2909_v3 }
 0xe5c   :  { %2442 = vmatprep.subr.bf16.mxu1 %v2909_v3 }
 0xe5d   :  { %2451 = vmatpush3.bf16.msra.mxu0 %v3156_v41 }
 0xe5e   :  { %2464 = vmatprep.subr.bf16.mxu0 %v2909_v3 }
 0xe5f   :  { %2443 = vmatpush3.bf16.msra.mxu1 %v3093_v8 }
 0xe60   :  { %2456 = vmatprep.subr.bf16.mxu1 %v2909_v3 }
 0xf2b   :  { %v1270_v21 = vpop.f32.mrb[24].mxu0 }
 0xf2c   :  { %v1277_v24 = vrot.slane %v1270_v21, 4  ;;  %v2438_v25 = vpop.f32.mrb[25].mxu0  ;;  %v2720_v21 = vld [vmem:[%s3654_s3] sm:$0xff]  }
 0xf2d   :  { %v1273_v27 = vpop.f32.mrb[26].mxu0  ;;  %v1191_v6 = vpop.f32.mrb[20].mxu1 }
 0xf2e   :  { %v1279_v28 = vadd.f32 %v1277_v24, %v3174_v55  ;;  %v2439_v29 = vpop.f32.mrb[27].mxu0  ;;  %v1198_v31 = vrot.slane %v1191_v6, 6  ;;  %v2430_v32 = vpop.f32.mrb[21].mxu1 }
 0xf2f   :  { %v1194_v33 = vpop.f32.mrb[22].mxu1 }
 0xf30   :  { %2662 = vtanh.f32 %v1279_v28  ;;  %v1200_v36 = vadd.f32 %v1198_v31, %v3176_v57  ;;  %v2431_v37 = vpop.f32.mrb[23].mxu1  ;;  %v2254_v42 = vmul.f32 -1.442695, %v1279_v28 }
 0xf32   :  { %2664 = vtanh.f32 %v1200_v36  ;;  %v2252_v43 = vmul.f32 -1.442695, %v1200_v36 }
 0xf33   :  { %2666 = vpow2.f32 %v2254_v42 }
 0xf34   :  { %2668 = vpow2.f32 %v2252_v43 }
 0xf3a   :  { %v2663_v40 = vpop.eup %2662 }
 0xf3b   :  { %1292 = vrot.lane.b32.xlu1 %v2663_v40, %s2907_s7 }
 0xf3c   :  { %v2665_v8 = vpop.eup %2664 }
 0xf3d   :  { %1213 = vrot.lane.b32.xlu0 %v2665_v8, %s2907_s7  ;;  %v2667_v44 = vpop.eup %2666 }
 0xf3e   :  { %v2669_v45 = vpop.eup %2668  ;;  %v1283_v46 = vadd.f32 1.0, %v2667_v44 }
 0xf3f   :  { %v1204_v48 = vadd.f32 1.0, %v2669_v45 }
 0xf40   :  { %2670 = vrcp.f32 %v1283_v46 }
 0xf41   :  { %2672 = vrcp.f32 %v1204_v48 }
 0xf4a   :  { %v2671_v49 = vpop.eup %2670 }
 0xf4b   :  { %v2673_v51 = vpop.eup %2672  ;;  %v1290_v56 = vmul.f32 %v2671_v49, %v1288_v54 }
 0xf4c   :  { %v1211_v62 = vmul.f32 %v2673_v51, %v1209_v60 }
 0xfad   :  { %v1293_v50 = vpop.permute.xlu1 %1292 }
 0xfae   :  { %v1295_v61 = vmul.f32 %v2671_v49, %v1293_v50 }
 0xfaf   :  { %v1214_v52 = vpop.permute.xlu0 %1213 }
 0xfb0   :  { %1297 = vrot.lane.b32.xlu1 %v1295_v61, %s2912_s4  ;;  %v1216_v53 = vmul.f32 %v2673_v51, %v1214_v52 }
 0xfb2   :  { %1218 = vrot.lane.b32.xlu0 %v1216_v53, %s2912_s4 }
0x1022   :  { %v1298_v58 = vpop.permute.xlu1 %1297 }
0x1023   :  { %v3388_v59 = vadd.f32 %v1298_v58, %v1290_v56 }
0x1024   :  { %v1219_v0 = vpop.permute.xlu0 %1218 }
0x1025   :  { %2674 = vtanh.f32 %v3388_v59  ;;  %v3391_v1 = vadd.f32 %v1219_v0, %v1211_v62  ;;  %v1446_v54 = vrot.slane %v3388_v59, 2 }
0x1027   :  { %2676 = vtanh.f32 %v3391_v1  ;;  %v1367_v60 = vrot.slane %v3391_v1, 6 }
0x102f   :  { %v2675_v2 = vpop.eup %2674 }
0x1030   :  { %1303 = vrot.lane.b32.xlu1 %v2675_v2, %s2907_s7 }
0x1031   :  { %v2677_v7 = vpop.eup %2676 }
0x1032   :  { %1224 = vrot.lane.b32.xlu0 %v2677_v7, %s2907_s7 }
0x10a2   :  { %v1304_v63 = vpop.permute.xlu1 %1303 }
0x10a3   :  { %v3396_v9 = vmul.f32 %v2671_v49, %v1304_v63 }
0x10a4   :  { %v1225_v4 = vpop.permute.xlu0 %1224 }
0x10a5   :  { %v1386_v5 = vpack.c.bf16 %v3396_v9, %v3396_v9  ;;  %v3400_v10 = vmul.f32 %v2673_v51, %v1225_v4 }
0x10a7   :  { %v1388_v13 = vrot.slane %v1386_v5, 2  ;;  %v1307_v12 = vpack.c.bf16 %v3400_v10, %v3400_v10 }
0x10a9   :  { %1389 = vrot.lane.b32.xlu1 %v1388_v13, %s2912_s4  ;;  %v1309_v17 = vrot.slane %v1307_v12, 1 }
0x10ab   :  { %1310 = vrot.lane.b32.xlu0 %v1309_v17, %s2912_s4 }
0x111b   :  { %v1390_v16 = vpop.permute.xlu1 %1389 }
0x111c   :  { %2453 = vmatmul.mubr.msk.bf16.vlgmr.msra.gmra.mrb[28].mxu0 %vm311_vm8, %v1390_v16 }
0x111d   :  { %2465 = vmatpush3.bf16.msra.mxu0 %v3147_v39  ;;  %2468 = vmatprep.mubr.msk.bf16.mxu0 %vm2911_vm3, %v2909_v3  ;;  %v1311_v19 = vpop.permute.xlu0 %1310  ;;  %v2721_v39 = vld [vmem:[%s3654_s3 + $0x8] sm:$0xff]  }
0x111e   :  { %2466 = vmatprep.subr.bf16.mxu0 %v2909_v3  ;;  %2445 = vmatmul.mubr.msk.bf16.vlgmr.msra.gmra.mrb[24].mxu1 %vm311_vm8, %v1311_v19 }
0x111f   :  { %2457 = vmatpush3.bf16.msra.mxu1 %v2720_v21  ;;  %2460 = vmatprep.mubr.msk.bf16.mxu1 %vm2911_vm3, %v2909_v3 }
0x1120   :  { %2458 = vmatprep.subr.bf16.mxu1 %v2909_v3 }
0x1121   :  { %2467 = vmatpush3.bf16.msra.mxu0 %v3156_v41 }
0x1122   :  { %2484 = vmatprep.subr.bf16.mxu0 %v2909_v3 }
0x1123   :  { %2459 = vmatpush3.bf16.msra.mxu1 %v2721_v39 }
0x1124   :  { %2472 = vmatprep.subr.bf16.mxu1 %v2909_v3 }
0x11ef   :  { %v1428_v24 = vpop.f32.mrb[28].mxu0 }
0x11f0   :  { %v1435_v25 = vrot.slane %v1428_v24, 6  ;;  %v2454_v27 = vpop.f32.mrb[29].mxu0 }
0x11f1   :  { %v1431_v28 = vpop.f32.mrb[30].mxu0  ;;  %v1349_v29 = vpop.f32.mrb[24].mxu1 }
0x11f2   :  { %v1437_v6 = vadd.f32 %v1435_v25, %v3174_v55  ;;  %v2455_v31 = vpop.f32.mrb[31].mxu0  ;;  %v1356_v32 = vrot.slane %v1349_v29, 4  ;;  %v2446_v33 = vpop.f32.mrb[25].mxu1 }
0x11f3   :  { %v1352_v41 = vpop.f32.mrb[26].mxu1 }
0x11f4   :  { %2678 = vtanh.f32 %v1437_v6  ;;  %v1358_v36 = vadd.f32 %v1356_v32, %v3176_v57  ;;  %v2447_v37 = vpop.f32.mrb[27].mxu1  ;;  %v2258_v42 = vmul.f32 -1.442695, %v1437_v6 }
0x11f6   :  { %2680 = vtanh.f32 %v1358_v36  ;;  %v2256_v43 = vmul.f32 -1.442695, %v1358_v36 }
0x11f7   :  { %2682 = vpow2.f32 %v2258_v42 }
0x11f8   :  { %2684 = vpow2.f32 %v2256_v43 }
0x11fe   :  { %v2679_v40 = vpop.eup %2678 }
0x11ff   :  { %1450 = vrot.lane.b32.xlu1 %v2679_v40, %s2907_s7 }
0x1200   :  { %v2681_v8 = vpop.eup %2680 }
0x1201   :  { %1371 = vrot.lane.b32.xlu0 %v2681_v8, %s2907_s7  ;;  %v2683_v44 = vpop.eup %2682 }
0x1202   :  { %v2685_v45 = vpop.eup %2684  ;;  %v1441_v46 = vadd.f32 1.0, %v2683_v44 }
0x1203   :  { %v1362_v48 = vadd.f32 1.0, %v2685_v45 }
0x1204   :  { %2686 = vrcp.f32 %v1441_v46 }
0x1205   :  { %2688 = vrcp.f32 %v1362_v48 }
0x120e   :  { %v2687_v49 = vpop.eup %2686 }
0x120f   :  { %v2689_v51 = vpop.eup %2688  ;;  %v1448_v56 = vmul.f32 %v2687_v49, %v1446_v54 }
0x1210   :  { %v1369_v0 = vmul.f32 %v2689_v51, %v1367_v60 }
0x1271   :  { %v1451_v50 = vpop.permute.xlu1 %1450 }
0x1272   :  { %v1453_v61 = vmul.f32 %v2687_v49, %v1451_v50 }
0x1273   :  { %v1372_v52 = vpop.permute.xlu0 %1371 }
0x1274   :  { %1455 = vrot.lane.b32.xlu1 %v1453_v61, %s2912_s4  ;;  %v1374_v53 = vmul.f32 %v2689_v51, %v1372_v52 }
0x1276   :  { %1376 = vrot.lane.b32.xlu0 %v1374_v53, %s2912_s4 }
0x12e6   :  { %v1456_v58 = vpop.permute.xlu1 %1455 }
0x12e7   :  { %v3432_v62 = vadd.f32 %v1456_v58, %v1448_v56 }
0x12e8   :  { %v1377_v2 = vpop.permute.xlu0 %1376 }
0x12e9   :  { %2690 = vtanh.f32 %v3432_v62  ;;  %v3435_v7 = vadd.f32 %v1377_v2, %v1369_v0 }
0x12eb   :  { %2692 = vtanh.f32 %v3435_v7  ;;  %v1525_v56 = vrot.slane %v3435_v7, 6  ;;  %v2532_v7 = vpack.i.bf16 %v3400_v10, %v3360_v15  ;;  %v2573_v15 = vld [vmem:[%s3657_s6 + $0x8] sm:$0xff]  }
0x12f3   :  { %v2691_v63 = vpop.eup %2690 }
0x12f4   :  { %1461 = vrot.lane.b32.xlu1 %v2691_v63, %s2907_s7  ;;  %v2572_v63 = vld [vmem:[%s3657_s6] sm:$0xff]  }
0x12f5   :  { %v2693_v5 = vpop.eup %2692 }
0x12f6   :  { %1382 = vrot.lane.b32.xlu0 %v2693_v5, %s2907_s7 }
0x1366   :  { %v1462_v59 = vpop.permute.xlu1 %1461 }
0x1367   :  { %v3440_v4 = vmul.f32 %v2687_v49, %v1462_v59  ;;  %v2537_v59 = vpack.i.bf16 %v3276_v20, %v3316_v14  ;;  %v2574_v20 = vld [vmem:[%s3657_s6 + $0x10] sm:$0xff]  }
0x1368   :  { %v1383_v13 = vpop.permute.xlu0 %1382 }
0x1369   :  { %v1544_v1 = vpack.c.bf16 %v3440_v4, %v3440_v4  ;;  %v3444_v12 = vmul.f32 %v2689_v51, %v1383_v13  ;;  %v1601_v51 = vrot.slane %v3432_v62, 2  ;;  %v2527_v62 = vpack.i.bf16 %v3240_v26, %v3200_v34 }
0x136a   :  { %v2547_v26 = vpack.i.bf16 %v3236_v23, %v3396_v9  ;;  %v2575_v23 = vld [vmem:[%s3657_s6 + $0x18] sm:$0xff]   ;;  %v2557_v13 = vpack.i.bf16 %v3196_v30, %v3356_v11  ;;  %s2913_s6 = smov 96  }
0x136b   :  { %v1546_v17 = vrot.slane %v1544_v1, 1  ;;  %v1465_v16 = vpack.c.bf16 %v3444_v12, %v3444_v12  ;;  %v2542_v34 = vpack.i.bf16 %v3444_v12, %v3280_v22 }
0x136d   :  { %1547 = vrot.lane.b32.xlu1 %v1546_v17, %s2912_s4  ;;  %v1467_v19 = vrot.slane %v1465_v16, 2 }
0x136f   :  { %1468 = vrot.lane.b32.xlu0 %v1467_v19, %s2912_s4 }
0x13df   :  { %v1548_v21 = vpop.permute.xlu1 %1547 }
0x13e0   :  { %2469 = vmatmul.mubr.msk.bf16.vlgmr.msra.gmra.mrb[32].mxu0 %vm311_vm8, %v1548_v21 }
0x13e1   :  { %2488 = vmatprep.mubr.msk.bf16.mxu0 %vm2911_vm3, %v2909_v3  ;;  %v1469_v39 = vpop.permute.xlu0 %1468 }
0x13e2   :  { %2461 = vmatmul.mubr.msk.bf16.vlgmr.msra.gmra.mrb[28].mxu1 %vm311_vm8, %v1469_v39 }
0x13e3   :  { %2480 = vmatprep.mubr.msk.bf16.mxu1 %vm2911_vm3, %v2909_v3  ;;  %2473 = vmatpush3.bf16.msra.mxu1 %v2572_v63 }
0x13e4   :  { %2474 = vmatprep.subr.bf16.mxu1 %v2909_v3 }
0x13e7   :  { %2475 = vmatpush3.bf16.msra.mxu1 %v2573_v15 }
0x13e8   :  { %2476 = vmatprep.subr.bf16.mxu1 %v2909_v3 }
0x13eb   :  { %2477 = vmatpush3.bf16.msra.mxu1 %v2574_v20 }
0x13ec   :  { %2478 = vmatprep.subr.bf16.mxu1 %v2909_v3 }
0x13ef   :  { %2479 = vmatpush3.bf16.msra.mxu1 %v2575_v23 }
0x13f0   :  { %2500 = vmatprep.subr.bf16.mxu1 %v2909_v3 }
0x14b3   :  { %v1586_v24 = vpop.f32.mrb[32].mxu0 }
0x14b4   :  { %v1592_v25 = vadd.f32 %v1586_v24, %v3174_v55  ;;  %v2470_v27 = vpop.f32.mrb[33].mxu0 }
0x14b5   :  { %v1589_v28 = vpop.f32.mrb[34].mxu0  ;;  %v1507_v6 = vpop.f32.mrb[28].mxu1 }
0x14b6   :  { %2694 = vtanh.f32 %v1592_v25  ;;  %v2471_v29 = vpop.f32.mrb[35].mxu0  ;;  %v1514_v31 = vrot.slane %v1507_v6, 2  ;;  %v2462_v32 = vpop.f32.mrb[29].mxu1  ;;  %v2262_v8 = vmul.f32 -1.442695, %v1592_v25 }
0x14b7   :  { %v1510_v33 = vpop.f32.mrb[30].mxu1 }
0x14b8   :  { %v1516_v41 = vadd.f32 %v1514_v31, %v3176_v57  ;;  %v2463_v36 = vpop.f32.mrb[31].mxu1 }
0x14ba   :  { %2696 = vtanh.f32 %v1516_v41  ;;  %v2260_v55 = vmul.f32 -1.442695, %v1516_v41 }
0x14bb   :  { %2698 = vpow2.f32 %v2262_v8 }
0x14bc   :  { %2700 = vpow2.f32 %v2260_v55 }
0x14c0   :  { %v2695_v37 = vpop.eup %2694 }
0x14c1   :  { %1605 = vrot.lane.b32.xlu0 %v2695_v37, %s2907_s7 }
0x14c4   :  { %v2697_v40 = vpop.eup %2696 }
0x14c5   :  { %1529 = vrot.lane.b32.xlu1 %v2697_v40, %s2907_s7  ;;  %v2699_v42 = vpop.eup %2698 }
0x14c6   :  { %v1596_v43 = vadd.f32 1.0, %v2699_v42  ;;  %v2701_v44 = vpop.eup %2700 }
0x14c7   :  { %v1520_v45 = vadd.f32 1.0, %v2701_v44 }
0x14c8   :  { %2702 = vrcp.f32 %v1596_v43 }
0x14c9   :  { %2704 = vrcp.f32 %v1520_v45 }
0x14d2   :  { %v2703_v46 = vpop.eup %2702 }
0x14d3   :  { %v2705_v49 = vpop.eup %2704  ;;  %v1603_v52 = vmul.f32 %v2703_v46, %v1601_v51 }
0x14d4   :  { %v1527_v60 = vmul.f32 %v2705_v49, %v1525_v56  ;;  %v2263_v56 = vld [vmem:[#allocation10] ss:$0 sm:$0xff] }
0x1533   :  { %v1606_v57 = vpop.permute.xlu0 %1605 }
0x1534   :  { %v1608_v48 = vmul.f32 %v2703_v46, %v1606_v57 }
0x1536   :  { %1610 = vrot.lane.b32.xlu0 %v1608_v48, %s2912_s4 }
0x1537   :  { %v1530_v50 = vpop.permute.xlu1 %1529 }
0x1538   :  { %v1532_v61 = vmul.f32 %v2705_v49, %v1530_v50 }
0x153a   :  { %1534 = vrot.lane.b32.xlu1 %v1532_v61, %s2912_s4 }
0x15a8   :  { %v1611_v53 = vpop.permute.xlu0 %1610 }
0x15a9   :  { %v3463_v54 = vadd.f32 %v1611_v53, %v1603_v52 }
0x15ab   :  { %2706 = vtanh.f32 %v3463_v54 }
0x15ac   :  { %v1535_v58 = vpop.permute.xlu1 %1534 }
0x15ad   :  { %v3467_v0 = vadd.f32 %v1535_v58, %v1527_v60 }
0x15af   :  { %2708 = vtanh.f32 %v3467_v0 }
0x15b5   :  { %v2707_v2 = vpop.eup %2706 }
0x15b6   :  { %1616 = vrot.lane.b32.xlu0 %v2707_v2, %s2907_s7 }
0x15b9   :  { %v2709_v5 = vpop.eup %2708 }
0x15ba   :  { %2528 = vrot.lane.b32.xlu0 %v2527_v62, %s2912_s4  ;;  %1540 = vrot.lane.b32.xlu1 %v2709_v5, %s2907_s7 }
0x15be   :  { %2533 = vrot.lane.b32.xlu0 %v2532_v7, %s2912_s4  ;;  %2538 = vrot.lane.b32.xlu1 %v2537_v59, %s2907_s7 }
0x15c2   :  { %2543 = vrot.lane.b32.xlu0 %v2542_v34, %s2912_s4  ;;  %2548 = vrot.lane.b32.xlu1 %v2547_v26, %s2907_s7 }
0x1628   :  { %v1617_v22 = vpop.permute.xlu0 %1616 }
0x1629   :  { %v3502_v14 = vmul.f32 %v2703_v46, %v1617_v22 }
0x162b   :  { %v2552_v9 = vpack.i.bf16 %v3440_v4, %v3502_v14 }
0x162c   :  { %v1541_v10 = vpop.permute.xlu1 %1540  ;;  %v2529_v12 = vpop.permute.xlu0 %2528 }
0x162d   :  { %2553 = vrot.lane.b32.xlu1 %v2552_v9, %s2907_s7  ;;  %v1543_v1 = vmul.f32 %v2705_v49, %v1541_v10  ;;  %v2531_v39 = vunpack.i.h.bf16 %v2529_v12  ;;  %v2530_v24 = vunpack.i.l.bf16 %v2529_v12 }
0x162f   :  { %1621 = vrot.lane.b32.xlu0 %v1543_v1, %s2912_s4 }
0x1630   :  { %v2539_v17 = vpop.permute.xlu1 %2538  ;;  %v2534_v16 = vpop.permute.xlu0 %2533 }
0x1631   :  { %1671 = vrot.lane.b32.xlu1 %v3321_v18, %s2912_s4  ;;  %v2541_v28 = vunpack.i.h.bf16 %v2539_v17  ;;  %v2540_v6 = vunpack.i.l.bf16 %v2539_v17  ;;  %v2536_v29 = vunpack.i.h.bf16 %v2534_v16  ;;  %v2535_v18 = vunpack.i.l.bf16 %v2534_v16 }
0x1633   :  { %2558 = vrot.lane.b32.xlu0 %v2557_v13, %s2907_s7  ;;  %v1696_v37 = vsel %vm311_vm8, %v2536_v29, %v2541_v28  ;;  %v1687_v40 = vsel %vm311_vm8, %v2535_v18, %v2540_v6 }
0x1634   :  { %v2549_v4 = vpop.permute.xlu1 %2548  ;;  %v2544_v19 = vpop.permute.xlu0 %2543  ;;  %v1714_v45 = vsel %vm255_vm1, %v1687_v40, %v1696_v37 }
0x1635   :  { %v2551_v31 = vunpack.i.h.bf16 %v2549_v4  ;;  %v2546_v32 = vunpack.i.h.bf16 %v2544_v19  ;;  %v2550_v41 = vunpack.i.l.bf16 %v2549_v4  ;;  %v2545_v36 = vunpack.i.l.bf16 %v2544_v19 }
0x1637   :  { %v1705_v8 = vsel %vm311_vm8, %v2546_v32, %v2551_v31  ;;  %v1669_v46 = vsel %vm311_vm8, %v2545_v36, %v2550_v41 }
0x1638   :  { %v1715_v48 = vsel %vm259_vm4, %v1714_v45, %v1705_v8 }
0x169f   :  { %v2554_v21 = vpop.permute.xlu1 %2553 }
0x16a0   :  { %v2556_v25 = vunpack.i.h.bf16 %v2554_v21  ;;  %v2555_v27 = vunpack.i.l.bf16 %v2554_v21 }
0x16a1   :  { %v1622_v30 = vpop.permute.xlu0 %1621 }
0x16a2   :  { %v1651_v11 = vsel %vm311_vm8, %v2530_v24, %v2555_v27  ;;  %v1660_v33 = vsel %vm311_vm8, %v2531_v39, %v2556_v25  ;;  %1625 = vst.msk [vmem:[#allocation13 - $0x6] sm:$0xc0] %vm1624_vm9, %v1622_v30 }
0x16a3   :  { %v1711_v55 = vsel %vm255_vm1, %v1651_v11, %v1660_v33  ;;  %v1672_v57 = vpop.permute.xlu1 %1671 }
0x16a4   :  { %v1712_v61 = vsel %vm259_vm4, %v1711_v55, %v1669_v46  ;;  %v2576_v55 = vld [vmem:[#allocation11] sm:$0xff]  }
0x16a5   :  { %v2559_v42 = vpop.permute.xlu0 %2558  ;;  %2485 = vmatpush3.bf16.msra.mxu0 %v2576_v55 }
0x16a6   :  { %v2561_v43 = vunpack.i.h.bf16 %v2559_v42  ;;  %v2560_v44 = vunpack.i.l.bf16 %v2559_v42  ;;  %2486 = vmatprep.subr.bf16.mxu0 %v2909_v3 }
0x16a8   :  { %v1710_v49 = vsel %vm311_vm8, %v1622_v30, %v2561_v43  ;;  %v1678_v50 = vsel %vm311_vm8, %v1672_v57, %v2560_v44  ;;  %v2577_v43 = vld [vmem:[#allocation11 + $0x8] sm:$0xff]  }
0x16a9   :  { %v1713_v51 = vsel %vm263_vm6, %v1712_v61, %v1678_v50  ;;  %v1716_v52 = vsel %vm263_vm6, %v1715_v48, %v1710_v49  ;;  %2487 = vmatpush3.bf16.msra.mxu0 %v2577_v43 }
0x16aa   :  { %v1717_v53 = vpack.c.bf16 %v1716_v52, %v1713_v51  ;;  %2492 = vmatprep.subr.bf16.mxu0 %v2909_v3 }
0x16ac   :  { %2481 = vmatmul.mubr.msk.bf16.vlgmr.msra.gmra.mrb[32].mxu1 %vm1757_vm10, %v1717_v53 }
0x16ad   :  { %2504 = vmatprep.mubr.msk.bf16.mxu1 %vm2911_vm3, %v2909_v3 }
0x177f   :  { %v1795_v60 = vpop.f32.mrb[32].mxu1 }
0x1780   :  { %v1796_v58 = vadd.f32 %v2263_v56, %v1795_v60  ;;  %v2482_v2 = vpop.f32.mrb[33].mxu1 }
0x1781   :  { %v1798_v62 = vpop.f32.mrb[34].mxu1  ;;  %v2579_v2 = vld [vmem:[%s3661_s10 + $0x8] sm:$0xff]  }
0x1782   :  { %v1802_v63 = vadd.f32 %v1796_v58, %v3137_v35  ;;  %v1799_v5 = vadd.f32 %v2263_v56, %v1798_v62  ;;  %v2483_v7 = vpop.f32.mrb[35].mxu1  ;;  %v2578_v56 = vld [vmem:[%s3661_s10] sm:$0xff]  }
0x1783   :  { %v2269_v62 = vld [vmem:[%s3660_s9] ss:$0 sm:$0xff] }
0x1784   :  { %v1804_v59 = vmul.f32 0.70710677, %v1802_v63  ;;  %v1803_v34 = vadd.f32 %v1799_v5, %v3142_v38  ;;  %v2914_v38 = vmov 1983009808  }
0x1785   :  { %v1823_v12 = vunpack.c.l.s4 %v2914_v38 }
0x1786   :  { %v1805_v26 = vmul.f32 0.70710677, %v1803_v34  ;;  %v1806_v15 = vmul.f32 %v1804_v59, %v1804_v59 }
0x1787   :  { %v1824_v17 = vunpack.c.0.s8 %v1823_v12 }
0x1788   :  { %v1808_v20 = vsel %vm311_vm8, %v1806_v15, 0.0  ;;  %v1807_v22 = vmul.f32 %v1805_v26, %v1805_v26 }
0x1789   :  { %1809 = vadd.xlane.f32.xlu1 %v1808_v20  ;;  %v1827_v16 = vsub.s32 %v1824_v17, %v3170_v47  ;;  %v2580_v20 = vld [vmem:[%s3663_s12] sm:$0xff]  }
0x178a   :  { %v1811_v23 = vsel %vm311_vm8, %v1807_v22, 0.0  ;;  %2501 = vmatpush3.bf16.msra.mxu1 %v2580_v20  ;;  %v2581_v22 = vld [vmem:[%s3663_s12 + $0x8] sm:$0xff]   ;;  %s2822_s12 = scalar_lea.vmem %s2142_s22, 64 }
0x178b   :  { %1812 = vadd.xlane.f32.xlu0 %v1811_v23  ;;  %2502 = vmatprep.subr.bf16.mxu1 %v2909_v3  ;;  %v2273_v23 = vld [vmem:[%s3662_s11] ss:$0 sm:$0xff]  ;;  %p2823_p9 = scmp.ne.s32.totalorder %s2142_s22, %s2822_s12  ;;  %p2828_p11 = scmp.lt.s32.totalorder %s2822_s12, %s2822_s12 }
0x178d   :  { %p2829_p12 = por %p2828_p11, %p2827_p10 }
0x178e   :  { %2503 = vmatpush3.bf16.msra.mxu1 %v2581_v22 }
0x178f   :  { %p2830_p13 = pnand %p2829_p12, %p2823_p9 }
0x179a   :  { %1634 = vrot.lane.b32.xlu1 %v3467_v0, %s2913_s6 }
0x1816   :  { %v1810_v9 = vpop.xlane.xlu1 %1809 }
0x1817   :  { %v1814_v35 = vmax.f32 %v1810_v9, 1e-24 }
0x1818   :  { %v1813_v10 = vpop.xlane.xlu0 %1812 }
0x1819   :  { %2710 = vrsqrt.f32 %v1814_v35  ;;  %v1815_v1 = vmax.f32 %v1813_v10, 1e-24 }
0x181a   :  { %v1635_v13 = vpop.permute.xlu1 %1634 }
0x181b   :  { %2712 = vrsqrt.f32 %v1815_v1  ;;  %1637 = vst.msk [vmem:[#allocation14 - $0x6] sm:$0xc0] %vm1624_vm9, %v1635_v13 }
0x1823   :  { %v2711_v4 = vpop.eup %2710 }
0x1824   :  { %v1818_v19 = vmul.f32 %v2711_v4, %v1804_v59 }
0x1825   :  { %v2713_v21 = vpop.eup %2712 }
0x1826   :  { %v1819_v39 = vmul.f32 %v2713_v21, %v1805_v26  ;;  %v1828_v0 = vrot.slane %v1818_v19, %v1827_v16  ;;  %v1885_v24 = vrot.slane %v1818_v19, 2  ;;  %1820 = vst.msk [vmem:[%s3665_s14] sm:$0x3] %vm1631_vm11, %v1818_v19  ;;  %v1835_v31 = vcombine.high %v1818_v19, %v1818_v19 }
0x1828   :  { %v1829_v25 = vcombine.high %v1828_v0, %v1828_v0  ;;  %v1862_v27 = vrot.slane %v1819_v39, %v1827_v16  ;;  %v1887_v28 = vadd.f32 %v1885_v24, %v1818_v19  ;;  %1854 = vst.msk [vmem:[%s3665_s14 + $0x2] sm:$0x3] %vm1631_vm11, %v1819_v39  ;;  %v1888_v47 = vrot.slane %v1819_v39, 2 }
0x1829   :  { %v1842_v33 = vrot.slane %v1835_v31, %v1827_v16  ;;  %v1868_v42 = vcombine.high %v1819_v39, %v1819_v39 }
0x182a   :  { %1830 = vrot.lane.b32.xlu1 %v1829_v25, %s2912_s4  ;;  %v1890_v6 = vadd.f32 %v1888_v47, %v1819_v39  ;;  %v1892_v29 = vrot.slane %v1887_v28, 4  ;;  %v1863_v18 = vcombine.high %v1862_v27, %v1862_v27 }
0x182b   :  { %v1848_v37 = vcombine.high %v1842_v33, %v1842_v33  ;;  %v1875_v44 = vrot.slane %v1868_v42, %v1827_v16 }
0x182c   :  { %v1896_v32 = vrot.slane %v1890_v6, 4  ;;  %v1894_v30 = vadd.f32 %v1892_v29, %v1887_v28 }
0x182d   :  { %v1880_v45 = vcombine.high %v1875_v44, %v1875_v44 }
0x182e   :  { %1864 = vrot.lane.b32.xlu1 %v1863_v18, %s2912_s4  ;;  %v1898_v11 = vadd.f32 %v1896_v32, %v1890_v6 }
0x1830   :  { %v1899_v41 = vadd.f32 %v1898_v11, %v1894_v30 }
0x1832   :  { %1843 = vrot.lane.b32.xlu1 %v1842_v33, %s2907_s7  ;;  %v1900_v36 = vmul.f32 0.125, %v1899_v41 }
0x1834   :  { %v1901_v40 = vmul.f32 %v1900_v36, %v1900_v36 }
0x1836   :  { %1849 = vrot.lane.b32.xlu1 %v1848_v37, %s2913_s6  ;;  %v1902_v8 = vsel %vm1631_vm11, %v1901_v40, 0.0 }
0x1837   :  { %1903 = vadd.xlane.f32.xlu0 %v1902_v8 }
0x184d   :  { %1639 = vrot.lane.b32.xlu0 %v3463_v54, %s2913_s6 }
0x1851   :  { %1627 = vrot.lane.b32.xlu0 %v3502_v14, %s2912_s4 }
0x1855   :  { %1876 = vrot.lane.b32.xlu0 %v1875_v44, %s2907_s7 }
0x1859   :  { %1881 = vrot.lane.b32.xlu0 %v1880_v45, %s2913_s6 }
0x189c   :  { %v1831_v54 = vpop.permute.xlu1 %1830 }
0x189d   :  { %1834 = vst.msk [vmem:[%s3665_s14] sm:$0x3] %vm1833_vm12, %v1831_v54 }
0x18a0   :  { %v1865_v46 = vpop.permute.xlu1 %1864 }
0x18a1   :  { %1867 = vst.msk [vmem:[%s3665_s14 + $0x2] sm:$0x3] %vm1833_vm12, %v1865_v46 }
0x18a4   :  { %v1844_v14 = vpop.permute.xlu1 %1843 }
0x18a5   :  { %1847 = vst.msk [vmem:[%s3665_s14] sm:$0x3] %vm1846_vm13, %v1844_v14 }
0x18a8   :  { %v1850_v57 = vpop.permute.xlu1 %1849 }
0x18a9   :  { %1853 = vst.msk [vmem:[%s3665_s14] sm:$0x3] %vm1852_vm14, %v1850_v57 }
0x18c4   :  { %v1904_v48 = vpop.xlane.xlu0 %1903 }
0x18c5   :  { %v1905_v49 = vmax.f32 %v1904_v48, 1e-24 }
0x18c7   :  { %2714 = vrsqrt.f32 %v1905_v49 }
0x18c8   :  { %v1640_v50 = vpop.permute.xlu0 %1639 }
0x18c9   :  { %1643 = vst.msk [vmem:[#allocation14 + $0x2] sm:$0x3] %vm1631_vm11, %v1640_v50 }
0x18cc   :  { %v1628_v61 = vpop.permute.xlu0 %1627 }
0x18cd   :  { %1632 = vst.msk [vmem:[#allocation13 + $0x2] sm:$0x3] %vm1631_vm11, %v1628_v61 }
0x18d0   :  { %v1877_v51 = vpop.permute.xlu0 %1876 }
0x18d1   :  { %v2715_v52 = vpop.eup %2714  ;;  %1879 = vst.msk [vmem:[%s3665_s14 + $0x2] sm:$0x3] %vm1846_vm13, %v1877_v51 }
0x18d2   :  { %v1907_v53 = vmul.f32 %v2715_v52, %v1900_v36 }
0x18d4   :  { %1908 = vst.msk [vmem:[#allocation16] sm:$0x3] %vm1631_vm11, %v1907_v53  ;;  %v1882_v60 = vpop.permute.xlu0 %1881  ;;  %v1909_v58 = vpack.c.bf16 %v1907_v53, %v1907_v53 }
0x18d5   :  { %1884 = vst.msk [vmem:[%s3665_s14 + $0x2] sm:$0x3] %vm1852_vm14, %v1882_v60 }
0x18d6   :  { %2489 = vmatmul.mubr.msk.bf16.vlgmr.msra.gmra.mrb[36].mxu0 %vm311_vm8, %v1909_v58 }
0x18d7   :  { %2493 = vmatpush3.bf16.msra.mxu0 %v2578_v56  ;;  %2496 = vmatprep.mubr.msk.bf16.mxu0 %vm2911_vm3, %v2909_v3 }
0x18d8   :  { %2494 = vmatprep.subr.bf16.mxu0 %v2909_v3 }
0x18db   :  { %2495 = vmatpush3.bf16.msra.mxu0 %v2579_v2 }
0x19a9   :  { %v1970_v63 = vpop.f32.mrb[36].mxu0 }
0x19aa   :  { %v1971_v5 = vadd.f32 %v2269_v62, %v1970_v63  ;;  %v2490_v7 = vpop.f32.mrb[37].mxu0 }
0x19ab   :  { %v1973_v59 = vpop.f32.mrb[38].mxu0 }
0x19ac   :  { %v1976_v34 = vmax.f32 %v1971_v5, 0.0  ;;  %v2491_v26 = vpop.f32.mrb[39].mxu0 }
0x19ae   :  { %v1977_v15 = vpack.c.bf16 %v1976_v34, %v1976_v34 }
0x19b0   :  { %2497 = vmatmul.mubr.msk.bf16.vlgmr.msra.gmra.mrb[40].mxu0 %vm311_vm8, %v1977_v15 }
0x1a83   :  { %v2038_v9 = vpop.f32.mrb[40].mxu0 }
0x1a84   :  { %v2039_v35 = vadd.f32 %v2273_v23, %v2038_v9  ;;  %v2498_v10 = vpop.f32.mrb[41].mxu0 }
0x1a85   :  { %v2041_v1 = vpop.f32.mrb[42].mxu0 }
0x1a86   :  { %v2044_v13 = vmax.f32 %v2039_v35, 0.0  ;;  %v2499_v38 = vpop.f32.mrb[43].mxu0 }
0x1a88   :  { %v2045_v12 = vadd.f32 %v2044_v13, %v1907_v53 }
0x1a8a   :  { %v2046_v17 = vmul.f32 0.70710677, %v2045_v12 }
0x1a8c   :  { %v2047_v16 = vpack.c.bf16 %v2046_v17, %v2046_v17 }
0x1a8e   :  { %2505 = vmatmul.mubr.msk.bf16.vlgmr.msra.gmra.mrb[36].mxu1 %vm311_vm8, %v2047_v16 }
0x1a8f   :  { %2833 = shalt.err (!%p2830_p13)
}
0x1a90   :  { %s2834_s23 = scalar_lea.hbm %s3667_s16, 64 }
0x1a91   :  { %p2835_p0 = scmp.ne.s32.totalorder %s3667_s16, %s2834_s23  ;;  %p2838_p1 = scmp.lt.u32.totalorder %s2834_s23, %s3667_s16 }
0x1a93   :  { %p2840_p2 = pnand %p2838_p1, %p2835_p0 }
0x1a95   :  { %2843 = shalt.err (!%p2840_p2)
}
0x1a96   :  { %s2916_s3 = smov 2   ;;  %s2917_s26 = smov [#allocation13]  }
0x1a97   :  { %2147 = dma.vmem_to_hbm [thread:$0]  %s2142_s22, 64, %s3667_s16, [#allocation15], %s2912_s4, %s2912_s4, %s2916_s3  }
0x1a98   :  { %s2129_s29 = sshll.u32 %s2917_s26, 4  ;;  %s2918_s21 = smov [#allocation16]   ;;  %s2130_s29 = int_to_ptr.vmem [resolvable:$true] %s2129_s29 }
0x1a99   :  { %s2154_s25 = sshll.u32 %s2918_s21, 4  ;;  %s2844_s27 = scalar_lea.vmem %s2130_s29, 64  ;;  %s2155_s25 = int_to_ptr.vmem [resolvable:$true] %s2154_s25 }
0x1a9a   :  { %p2845_p3 = scmp.ne.s32.totalorder %s2130_s29, %s2844_s27  ;;  %p2849_p4 = scmp.lt.s32.totalorder %s2130_s29, %s2130_s29 }
0x1a9b   :  { %p2850_p5 = scmp.lt.s32.totalorder %s2844_s27, %s2844_s27 }
0x1a9d   :  { %p2851_p6 = por %p2850_p5, %p2849_p4 }
0x1a9f   :  { %p2852_p7 = pnand %p2851_p6, %p2845_p3 }
0x1aa1   :  { %2855 = shalt.err (!%p2852_p7)
}
0x1aa2   :  { %s2856_s14 = scalar_lea.hbm %s3666_s15, 64 }
0x1aa3   :  { %p2857_p8 = scmp.ne.s32.totalorder %s3666_s15, %s2856_s14  ;;  %p2860_p9 = scmp.lt.u32.totalorder %s2856_s14, %s3666_s15 }
0x1aa5   :  { %p2862_p10 = pnand %p2860_p9, %p2857_p8 }
0x1aa7   :  { %2865 = shalt.err (!%p2862_p10)
}
0x1aa8   :  { %2135 = dma.vmem_to_hbm [thread:$0]  %s2130_s29, 64, %s3666_s15, [#allocation5], %s2912_s4, %s2912_s4, %s2916_s3  }
0x1aa9   :  { %s2866_s28 = scalar_lea.vmem %s2155_s25, 32  ;;  %p2871_p12 = scmp.lt.s32.totalorder %s2155_s25, %s2155_s25 }
0x1aaa   :  { %p2867_p11 = scmp.ne.s32.totalorder %s2155_s25, %s2866_s28  ;;  %p2872_p13 = scmp.lt.s32.totalorder %s2866_s28, %s2866_s28 }
0x1aac   :  { %p2873_p0 = por %p2872_p13, %p2871_p12 }
0x1aae   :  { %p2874_p1 = pnand %p2873_p0, %p2867_p11 }
0x1ab0   :  { %2877 = shalt.err (!%p2874_p1)
}
0x1ab1   :  { %s2878_s11 = scalar_lea.hbm %s3668_s17, 32 }
0x1ab2   :  { %p2879_p2 = scmp.ne.s32.totalorder %s3668_s17, %s2878_s11  ;;  %p2882_p3 = scmp.lt.u32.totalorder %s2878_s11, %s3668_s17 }
0x1ab4   :  { %p2884_p4 = pnand %p2882_p3, %p2879_p2 }
0x1ab6   :  { %2887 = shalt.err (!%p2884_p4)
}
0x1ab7   :  { %2157 = dma.vmem_to_hbm [thread:$0]  %s2155_s25, 32, %s3668_s17, [#allocation15]   ;;  %v2277_v3 = vld [vmem:[#allocation2] ss:$0 sm:$0xff]  ;;  %vm2120_vm15 = vcmask 1024  }
0x1b61   :  { %v2108_v4 = vpop.f32.mrb[36].mxu1 }
0x1b62   :  { %v2109_v19 = vadd.f32 %v2277_v3, %v2108_v4  ;;  %v2506_v21 = vpop.f32.mrb[37].mxu1 }
0x1b63   :  { %v2111_v39 = vpop.f32.mrb[38].mxu1 }
0x1b64   :  { %v2281_v0 = vmul.f32 -1.442695, %v2109_v19  ;;  %v2507_v24 = vpop.f32.mrb[39].mxu1 }
0x1b66   :  { %2716 = vpow2.f32 %v2281_v0 }
0x1b70   :  { %v2717_v25 = vpop.eup %2716 }
0x1b71   :  { %v2117_v27 = vadd.f32 1.0, %v2717_v25 }
0x1b73   :  { %2718 = vrcp.f32 %v2117_v27 }
0x1b7d   :  { %v2719_v28 = vpop.eup %2718 }
0x1b7e   :  { %2121 = vst.msk [vmem:[%s3669_s18] sm:$0x3] %vm2120_vm15, %v2719_v28 }
0x1b7f   :  { %2896 = dma.done.wait [#allocation5], 64  }
0x1b80   :  { %2897 = vsyncadd [#allocation5], 4294967232 }
0x1b81   :  { %2898 = dma.done.wait [#allocation15], 96  }
0x1b82   :  { %2899 = vsyncadd [#allocation15], 4294967200 }
0x1b83   :  { %2173 = vsyncpa [#allocation4], 1 }
0x1b84   :  { %2174 = vsyncpa [#allocation9], 1 }
0x1b85   :  { %2175 = vsyncpa [#allocation12], 1 }
0x1b86   :  { %2176 = vsyncpa [#allocation5], 1 }
0x1b87   :  { %2177 = vsyncpa [#allocation15], 1 }
0x1b88   :  { %2178 = vsyncpa [#allocation6], 1 }

</bundles_post_ra>
